<compile_context>
chip_gen: v7x
topology: tpu7x:2x2x1
jax: 0.10.0
libtpu: 0.0.40
codegen_flags: <defaults>
</compile_context>

<pallas_src>
import functools

import jax
import jax.numpy as jnp
from jax.experimental import pallas as pl
from jax.experimental.pallas import tpu as pltpu


def _cdiv(a, b):
    return -(-a // b)


def _round_up(v, m):
    return _cdiv(v, m) * m


def _pad_gate_dim(w, H, Hp, axis):
    """Pad a [i,f,g,o]-stacked parameter from 4H to 4Hp along `axis` (zero pad per gate)."""
    if Hp == H:
        return w
    parts = jnp.split(w, 4, axis=axis)
    pad = [(0, 0)] * w.ndim
    pad[axis] = (0, Hp - H)
    return jnp.concatenate([jnp.pad(p, pad) for p in parts], axis=axis)


def _physical_vmem_bytes():
    """Physical VMEM of the local TPU (conservative 64 MiB fallback, v7x-sized)."""
    try:
        info = pltpu.get_tpu_info()
        v = getattr(info, "vmem_capacity_bytes", None)
        if v:
            return int(v)
    except Exception:
        pass
    return 64 * 2 ** 20


def _lstm_kernel(len_ref, x_ref, wih_ref, whh_ref, bias_ref,
                 out_ref, ht_ref, ct_ref, *, hidden, time_chunk):
    """One grid step == `time_chunk` timesteps of the recurrence for one batch block.

    len_ref : (Bblk, 1)        int32    sequence lengths (padded rows = 0)
    x_ref   : (TC, Bblk, I)    mm dtype time-major input chunk
    wih_ref : (I, 4Hp)         mm dtype input->gates weights (transposed vs torch)
    whh_ref : (Hp, 4Hp)        mm dtype hidden->gates weights (transposed vs torch)
    bias_ref: (1, 4Hp)         f32      b_ih + b_hh (per-gate zero padded)
    out_ref : (Bblk, TC, Hp)   f32      batch-first output (0 at padded positions)
    ht_ref  : (Bblk, Hp)       f32      resident hidden state (final value = last valid h)
    ct_ref  : (Bblk, Hp)       f32      resident cell state
    """
    Hp = hidden
    t0 = pl.program_id(1) * time_chunk

    @pl.when(pl.program_id(1) == 0)
    def _():
        ht_ref[...] = jnp.zeros_like(ht_ref)
        ct_ref[...] = jnp.zeros_like(ct_ref)

    lens = len_ref[...]            # (Bblk, 1) int32
    bias = bias_ref[...]           # (1, 4Hp) f32
    wih = wih_ref[...]             # (I, 4Hp)   hoisted once (no per-step reload copy)
    whh = whh_ref[...]             # (Hp, 4Hp)

    h = ht_ref[...]                # (Bblk, Hp) f32
    c = ct_ref[...]

    # Static Python unroll: every slice / store index below is compile-time static,
    # which keeps the per-timestep output store a plain static (masked) sublane store.
    for i in range(time_chunk):
        gates = (jnp.dot(x_ref[i], wih, preferred_element_type=jnp.float32)
                 + jnp.dot(h.astype(whh.dtype), whh,
                           preferred_element_type=jnp.float32)
                 + bias)                                      # (Bblk, 4Hp) f32

        # sigmoid(x) == 0.5 * tanh(0.5 * x) + 0.5  (exact; one EUP op per gate)
        i_g = 0.5 * jnp.tanh(0.5 * gates[:, 0 * Hp:1 * Hp]) + 0.5
        f_g = 0.5 * jnp.tanh(0.5 * gates[:, 1 * Hp:2 * Hp]) + 0.5
        g_g = jnp.tanh(gates[:, 2 * Hp:3 * Hp])
        o_g = 0.5 * jnp.tanh(0.5 * gates[:, 3 * Hp:4 * Hp]) + 0.5

        c_new = f_g * c + i_g * g_g
        h_new = o_g * jnp.tanh(c_new)

        valid = (t0 + i) < lens                               # (Bblk, 1) bool
        h = jnp.where(valid, h_new, h)
        c = jnp.where(valid, c_new, c)
        # Batch-first store: timestep i lands on sublane i of the (Bblk, TC, Hp) block.
        out_ref[:, i, :] = jnp.where(valid, h_new, 0.0).astype(out_ref.dtype)

    ht_ref[...] = h
    ct_ref[...] = c


def dynamic_lstm_pallas(x, x_len, w_ih, w_hh, b_ih, b_hh, *,
                        time_chunk=32, batch_block=256,
                        matmul_dtype=jnp.bfloat16):
    """x: (B, T, I) float (batch_first), x_len: (B,) int32.

    Returns (out, (ht, ct)):
      out: (B, T, H) with zeros past each sequence's length (equal to the torch
           output zero-padded from max(x_len) to T), ht/ct: (1, B, H).
    Only num_layers=1, unidirectional, rnn_type='LSTM' is implemented (the module's
    default configuration).  Pass matmul_dtype=jnp.float32 for a fully-f32 recurrence.
    """
    B, T, I = x.shape
    H = w_hh.shape[1]
    assert w_ih.shape == (4 * H, I) and w_hh.shape == (4 * H, H)

    f32 = jnp.float32
    mm = jnp.dtype(matmul_dtype)

    Hp = _round_up(H, 128)                       # lane-align gates / output
    B8 = _round_up(B, 8)                         # sublane-align batch
    T8 = _round_up(T, 8)

    # ---- batch blocking: minimize padding; keep >= 2 blocks so the "parallel" batch
    # axis can shard across v7x's two TensorCores (no-op on v5e/v6e) ----------------
    n_b = max(1, _cdiv(B8, max(8, _round_up(batch_block, 8))))
    if B8 >= 16:
        n_b = max(n_b, 2)
    n_b = min(n_b, B8 // 8)

    def _fit_batch(nb):
        blk = _round_up(_cdiv(B8, nb), 8)
        return blk, nb * blk

    Bblk, Bp = _fit_batch(n_b)
    tc = min(_round_up(max(8, time_chunk), 8), T8)

    def _vmem_estimate(tc_, bblk_):
        g4 = 4 * Hp
        by = 2 * tc_ * bblk_ * I * mm.itemsize        # x blocks (double-buffered)
        by += 2 * bblk_ * tc_ * Hp * 4                # out blocks (f32, double-buffered)
        by += 2 * (I + Hp) * g4 * mm.itemsize         # resident W_ih^T / W_hh^T
        by += 2 * 8 * g4 * 4 + 2 * bblk_ * 128 * 4    # bias + lens (tile-padded)
        by += 4 * bblk_ * Hp * 4                      # resident ht/ct blocks
        by += 2 * bblk_ * Hp * 4                      # h/c carries (in-kernel)
        by += 3 * bblk_ * g4 * 4                      # gates + matmul partials
        by += 6 * bblk_ * Hp * 4                      # gate / select temporaries
        return by

    phys = _physical_vmem_bytes()
    budget = int(0.85 * phys)
    # Prefer shrinking the time chunk, then the batch block, over raising the scoped
    # VMEM limit past what the chip physically has (v7x: 64 MiB).
    while _vmem_estimate(tc, Bblk) > budget and tc > 8:
        tc = max(8, _round_up(tc // 2, 8))
    while _vmem_estimate(tc, Bblk) > budget and n_b < B8 // 8:
        n_b = min(B8 // 8, n_b * 2)
        Bblk, Bp = _fit_batch(n_b)

    n_t = _cdiv(T8, tc)
    tc = min(tc, _round_up(_cdiv(T8, n_t), 8))   # trim time padding where possible
    Tp = n_t * tc

    # ---- parameters: per-gate zero pad 4H -> 4Hp, transpose so the hot path is plain
    # row-major MXU matmuls.  Padded hidden units stay identically zero. -------------
    w_ih_p = _pad_gate_dim(w_ih.astype(f32), H, Hp, axis=0)              # (4Hp, I)
    w_hh_p = _pad_gate_dim(w_hh.astype(f32), H, Hp, axis=0)              # (4Hp, H)
    w_hh_p = jnp.pad(w_hh_p, ((0, 0), (0, Hp - H)))                      # (4Hp, Hp)
    bias_p = _pad_gate_dim((b_ih + b_hh).astype(f32), H, Hp, axis=0)     # (4Hp,)

    wih_t = jnp.transpose(w_ih_p).astype(mm)                             # (I, 4Hp)
    whh_t = jnp.transpose(w_hh_p).astype(mm)                             # (Hp, 4Hp)
    bias2 = bias_p.reshape(1, 4 * Hp)                                    # (1, 4Hp)

    # The input projection is fused into the kernel, so the only wrapper-side pass over
    # x is this cast + transpose + pad (born-padded, time-major so per-step slices are
    # dense); there is no (T, B, 4H) gates_x intermediate in HBM at all.
    xt = jnp.transpose(x.astype(mm), (1, 0, 2))                          # (T, B, I)
    if (Tp, Bp) != (T, B):
        xt = jnp.pad(xt, ((0, Tp - T), (0, Bp - B), (0, 0)))
    lens = x_len.astype(jnp.int32)
    if Bp != B:
        lens = jnp.pad(lens, (0, Bp - B))
    lens = lens.reshape(Bp, 1)

    kernel = functools.partial(_lstm_kernel, hidden=Hp, time_chunk=tc)

    cp_kwargs = dict(dimension_semantics=("parallel", "arbitrary"))
    est = _vmem_estimate(tc, Bblk)
    if est > 12 * 2 ** 20:
        cp_kwargs["vmem_limit_bytes"] = int(min(max(est * 1.3, 32 * 2 ** 20),
                                                0.9 * phys))

    # TODO(synk): on v7x, pipeline_mode=pl.Buffered(1) on the W_ih^T / W_hh^T / bias
    # BlockSpecs would drop their redundant second pipeline buffer (constant index).
    out_full, ht, ct = pl.pallas_call(
        kernel,
        out_shape=(
            jax.ShapeDtypeStruct((Bp, Tp, Hp), f32),
            jax.ShapeDtypeStruct((Bp, Hp), f32),
            jax.ShapeDtypeStruct((Bp, Hp), f32),
        ),
        grid_spec=pltpu.PrefetchScalarGridSpec(
            num_scalar_prefetch=0,
            grid=(n_b, n_t),
            in_specs=[
                pl.BlockSpec((Bblk, 1), lambda b, t: (b, 0)),            # lengths
                pl.BlockSpec((tc, Bblk, I), lambda b, t: (t, b, 0)),     # x chunk
                pl.BlockSpec((I, 4 * Hp), lambda b, t: (0, 0)),          # W_ih^T (resident)
                pl.BlockSpec((Hp, 4 * Hp), lambda b, t: (0, 0)),         # W_hh^T (resident)
                pl.BlockSpec((1, 4 * Hp), lambda b, t: (0, 0)),          # bias
            ],
            out_specs=[
                pl.BlockSpec((Bblk, tc, Hp), lambda b, t: (b, t, 0)),    # out (batch-first)
                pl.BlockSpec((Bblk, Hp), lambda b, t: (b, 0)),           # ht (state carrier)
                pl.BlockSpec((Bblk, Hp), lambda b, t: (b, 0)),           # ct (state carrier)
            ],
        ),
        compiler_params=pltpu.CompilerParams(**cp_kwargs),
    )(lens, xt, wih_t, whh_t, bias2)

    # Un-pad.  Output stays full length T (zeros past each sequence) to avoid a
    # data-dependent host sync; slice out[:, :max(x_len)] outside jit if the exact
    # torch padding is required.  No transpose needed: the kernel already wrote (B,T,H).
    out = out_full[:B, :T, :H]                                           # (B, T, H)
    ht = ht[:B, :H][None]                                                # (1, B, H)
    ct = ct[:B, :H][None]                                                # (1, B, H)
    return out, (ht, ct)


def _reference_lstm(x, x_len, w_ih, w_hh, b_ih, b_hh):
    """Plain-JAX reference mirroring torch masked-LSTM semantics (full-length output)."""
    B, T, I = x.shape
    H = w_hh.shape[1]
    h = jnp.zeros((B, H), jnp.float32)
    c = jnp.zeros((B, H), jnp.float32)
    outs = []
    for t in range(T):
        gates = x[:, t] @ w_ih.T + h @ w_hh.T + b_ih + b_hh
        i_g = jax.nn.sigmoid(gates[:, 0 * H:1 * H])
        f_g = jax.nn.sigmoid(gates[:, 1 * H:2 * H])
        g_g = jnp.tanh(gates[:, 2 * H:3 * H])
        o_g = jax.nn.sigmoid(gates[:, 3 * H:4 * H])
        c_new = f_g * c + i_g * g_g
        h_new = o_g * jnp.tanh(c_new)
        valid = (t < x_len)[:, None].astype(jnp.float32)
        h = valid * h_new + (1 - valid) * h
        c = valid * c_new + (1 - valid) * c
        outs.append(valid * h_new)
    out = jnp.stack(outs, axis=1)                                        # (B, T, H)
    return out, (h[None], c[None])


if __name__ == "__main__":
    # Small shapes consistent with DynamicLSTM(input_size=16, hidden_size=32)
    B, T, I, H = 2, 8, 16, 32

    key = jax.random.PRNGKey(0)
    k_x, k_wih, k_whh, k_bih, k_bhh = jax.random.split(key, 5)

    x = jax.random.normal(k_x, (B, T, I), dtype=jnp.float32)
    x_len = jnp.array([8, 5], dtype=jnp.int32)

    # Init matching nn.LSTM's uniform(-1/sqrt(H), 1/sqrt(H)), gate order [i,f,g,o]
    bound = 1.0 / (H ** 0.5)
    w_ih = jax.random.uniform(k_wih, (4 * H, I), minval=-bound, maxval=bound, dtype=jnp.float32)
    w_hh = jax.random.uniform(k_whh, (4 * H, H), minval=-bound, maxval=bound, dtype=jnp.float32)
    b_ih = jax.random.uniform(k_bih, (4 * H,), minval=-bound, maxval=bound, dtype=jnp.float32)
    b_hh = jax.random.uniform(k_bhh, (4 * H,), minval=-bound, maxval=bound, dtype=jnp.float32)

    out_r, (ht_r, ct_r) = _reference_lstm(x, x_len, w_ih, w_hh, b_ih, b_hh)

    # f32 matmul path — tight correctness check.
    out32, (ht32, ct32) = dynamic_lstm_pallas(
        x, x_len, w_ih, w_hh, b_ih, b_hh, matmul_dtype=jnp.float32)
    jax.block_until_ready((out32, ht32, ct32))
    assert out32.shape == (B, T, H) and ht32.shape == (1, B, H) and ct32.shape == (1, B, H)
    assert jnp.allclose(out32, out_r, atol=1e-4), "f32 output mismatch"
    assert jnp.allclose(ht32, ht_r, atol=1e-4), "f32 ht mismatch"
    assert jnp.allclose(ct32, ct_r, atol=1e-4), "f32 ct mismatch"

    # bf16 matmul path (default perf config) — loose check (bf16 MXU operands).
    out, (ht, ct) = dynamic_lstm_pallas(x, x_len, w_ih, w_hh, b_ih, b_hh)
    jax.block_until_ready((out, ht, ct))
    assert out.shape == (B, T, H) and ht.shape == (1, B, H) and ct.shape == (1, B, H)
    assert jnp.allclose(out, out_r, atol=3e-2), "bf16 output mismatch"
    assert jnp.allclose(ht, ht_r, atol=3e-2), "bf16 ht mismatch"
    assert jnp.allclose(ct, ct_r, atol=3e-2), "bf16 ct mismatch"

    print("KERNEL_OK")
</pallas_src>

<mosaic_0001>
module attributes {stable_mosaic.version = 11 : i64} {
  func.func @_lstm_kernel(%arg0: i32, %arg1: i32, %arg2: memref<8x1xi32, #tpu.memory_space<vmem>>, %arg3: memref<8x8x16xf32, #tpu.memory_space<vmem>>, %arg4: memref<16x512xf32, #tpu.memory_space<vmem>>, %arg5: memref<128x512xf32, #tpu.memory_space<vmem>>, %arg6: memref<1x512xf32, #tpu.memory_space<vmem>>, %arg7: memref<8x8x128xf32, #tpu.memory_space<vmem>>, %arg8: memref<8x128xf32, #tpu.memory_space<vmem>>, %arg9: memref<8x128xf32, #tpu.memory_space<vmem>>) attributes {dimension_semantics = [#tpu.dimension_semantics<parallel>, #tpu.dimension_semantics<arbitrary>], iteration_bounds = array<i64: 1, 1>, scalar_prefetch = 0 : i64, scratch_operands = 0 : i64, tpu.core_type = #tpu.core_type<tc>, window_params = [{transform_indices = @transform_0, window_bounds = array<i64: 8, 1>}, {transform_indices = @transform_1, window_bounds = array<i64: 8, 8, 16>}, {pipeline_mode = #tpu.pipeline_mode<synchronous>, transform_indices = @transform_2, window_bounds = array<i64: 16, 512>}, {pipeline_mode = #tpu.pipeline_mode<synchronous>, transform_indices = @transform_3, window_bounds = array<i64: 128, 512>}, {pipeline_mode = #tpu.pipeline_mode<synchronous>, transform_indices = @transform_4, window_bounds = array<i64: 1, 512>}, {transform_indices = @transform_5, window_bounds = array<i64: 8, 8, 128>}, {transform_indices = @transform_6, window_bounds = array<i64: 8, 128>}, {transform_indices = @transform_7, window_bounds = array<i64: 8, 128>}]} {
    %c8_i32 = arith.constant 8 : i32
    %0 = arith.muli %arg1, %c8_i32 : i32
    %c0_i32 = arith.constant 0 : i32
    %1 = arith.cmpi eq, %arg1, %c0_i32 : i32
    %2 = arith.extui %1 : i1 to i32
    %c0_i32_0 = arith.constant 0 : i32
    %3 = arith.cmpi ne, %2, %c0_i32_0 : i32
    scf.if %3 {
      %cst_153 = arith.constant 0.000000e+00 : f32
      %444 = vector.broadcast %cst_153 : f32 to vector<8x128xf32>
      %c0_154 = arith.constant 0 : index
      %c0_155 = arith.constant 0 : index
      %445 = vector.load %arg8[%c0_154, %c0_155] : memref<8x128xf32, #tpu.memory_space<vmem>>, vector<8x128xf32>
      tpu.vector_store %arg8[%c0_154, %c0_155], %444 {strides = array<i32>} : memref<8x128xf32, #tpu.memory_space<vmem>>, vector<8x128xf32>,
      %cst_156 = arith.constant 0.000000e+00 : f32
      %446 = vector.broadcast %cst_156 : f32 to vector<8x128xf32>
      %c0_157 = arith.constant 0 : index
      %c0_158 = arith.constant 0 : index
      %447 = vector.load %arg9[%c0_157, %c0_158] : memref<8x128xf32, #tpu.memory_space<vmem>>, vector<8x128xf32>
      tpu.vector_store %arg9[%c0_157, %c0_158], %446 {strides = array<i32>} : memref<8x128xf32, #tpu.memory_space<vmem>>, vector<8x128xf32>,
    } else {
    }
    %c0 = arith.constant 0 : index
    %c0_1 = arith.constant 0 : index
    %4 = vector.load %arg2[%c0, %c0_1] : memref<8x1xi32, #tpu.memory_space<vmem>>, vector<8x1xi32>
    %c0_2 = arith.constant 0 : index
    %c0_3 = arith.constant 0 : index
    %5 = vector.load %arg6[%c0_2, %c0_3] : memref<1x512xf32, #tpu.memory_space<vmem>>, vector<1x512xf32>
    %c0_4 = arith.constant 0 : index
    %c0_5 = arith.constant 0 : index
    %6 = vector.load %arg4[%c0_4, %c0_5] : memref<16x512xf32, #tpu.memory_space<vmem>>, vector<16x512xf32>
    %c0_6 = arith.constant 0 : index
    %c0_7 = arith.constant 0 : index
    %7 = vector.load %arg5[%c0_6, %c0_7] : memref<128x512xf32, #tpu.memory_space<vmem>>, vector<128x512xf32>
    %c0_8 = arith.constant 0 : index
    %c0_9 = arith.constant 0 : index
    %8 = vector.load %arg8[%c0_8, %c0_9] : memref<8x128xf32, #tpu.memory_space<vmem>>, vector<8x128xf32>
    %c0_10 = arith.constant 0 : index
    %c0_11 = arith.constant 0 : index
    %9 = vector.load %arg9[%c0_10, %c0_11] : memref<8x128xf32, #tpu.memory_space<vmem>>, vector<8x128xf32>
    %c0_12 = arith.constant 0 : index
    %c0_13 = arith.constant 0 : index
    %c0_14 = arith.constant 0 : index
    %10 = vector.load %arg3[%c0_12, %c0_13, %c0_14] : memref<8x8x16xf32, #tpu.memory_space<vmem>>, vector<1x8x16xf32>
    %11 = vector.shape_cast %10 : vector<1x8x16xf32> to vector<8x16xf32>
    %cst = arith.constant dense<0.000000e+00> : vector<8x512xf32>
    %12 = tpu.matmul %11, %6, %cst {dimension_numbers = #tpu.dot_dimension_numbers<[1], [0], [0], [1], [0, 0, 1, 1], [], []>} : vector<8x16xf32>, vector<16x512xf32>, vector<8x512xf32> -> vector<8x512xf32>
    %cst_15 = arith.constant dense<0.000000e+00> : vector<8x512xf32>
    %13 = tpu.matmul %8, %7, %cst_15 {dimension_numbers = #tpu.dot_dimension_numbers<[1], [0], [0], [1], [0, 0, 1, 1], [], []>} : vector<8x128xf32>, vector<128x512xf32>, vector<8x512xf32> -> vector<8x512xf32>
    %14 = arith.addf %12, %13 : vector<8x512xf32>
    %15 = vector.broadcast %5 : vector<1x512xf32> to vector<8x512xf32>
    %16 = arith.addf %14, %15 : vector<8x512xf32>
    %17 = vector.extract_strided_slice %16 {offsets = [0, 0], sizes = [8, 128], strides = [1, 1]} : vector<8x512xf32> to vector<8x128xf32>
    %cst_16 = arith.constant 5.000000e-01 : f32
    %18 = vector.broadcast %cst_16 : f32 to vector<8x128xf32>
    %19 = arith.mulf %18, %17 : vector<8x128xf32>
    %20 = math.tanh %19 : vector<8x128xf32>
    %cst_17 = arith.constant 5.000000e-01 : f32
    %21 = vector.broadcast %cst_17 : f32 to vector<8x128xf32>
    %22 = arith.mulf %21, %20 : vector<8x128xf32>
    %cst_18 = arith.constant 5.000000e-01 : f32
    %23 = vector.broadcast %cst_18 : f32 to vector<8x128xf32>
    %24 = arith.addf %22, %23 : vector<8x128xf32>
    %25 = vector.extract_strided_slice %16 {offsets = [0, 128], sizes = [8, 128], strides = [1, 1]} : vector<8x512xf32> to vector<8x128xf32>
    %cst_19 = arith.constant 5.000000e-01 : f32
    %26 = vector.broadcast %cst_19 : f32 to vector<8x128xf32>
    %27 = arith.mulf %26, %25 : vector<8x128xf32>
    %28 = math.tanh %27 : vector<8x128xf32>
    %cst_20 = arith.constant 5.000000e-01 : f32
    %29 = vector.broadcast %cst_20 : f32 to vector<8x128xf32>
    %30 = arith.mulf %29, %28 : vector<8x128xf32>
    %cst_21 = arith.constant 5.000000e-01 : f32
    %31 = vector.broadcast %cst_21 : f32 to vector<8x128xf32>
    %32 = arith.addf %30, %31 : vector<8x128xf32>
    %33 = vector.extract_strided_slice %16 {offsets = [0, 256], sizes = [8, 128], strides = [1, 1]} : vector<8x512xf32> to vector<8x128xf32>
    %34 = math.tanh %33 : vector<8x128xf32>
    %35 = vector.extract_strided_slice %16 {offsets = [0, 384], sizes = [8, 128], strides = [1, 1]} : vector<8x512xf32> to vector<8x128xf32>
    %cst_22 = arith.constant 5.000000e-01 : f32
    %36 = vector.broadcast %cst_22 : f32 to vector<8x128xf32>
    %37 = arith.mulf %36, %35 : vector<8x128xf32>
    %38 = math.tanh %37 : vector<8x128xf32>
    %cst_23 = arith.constant 5.000000e-01 : f32
    %39 = vector.broadcast %cst_23 : f32 to vector<8x128xf32>
    %40 = arith.mulf %39, %38 : vector<8x128xf32>
    %cst_24 = arith.constant 5.000000e-01 : f32
    %41 = vector.broadcast %cst_24 : f32 to vector<8x128xf32>
    %42 = arith.addf %40, %41 : vector<8x128xf32>
    %43 = arith.mulf %32, %9 : vector<8x128xf32>
    %44 = arith.mulf %24, %34 : vector<8x128xf32>
    %45 = arith.addf %43, %44 : vector<8x128xf32>
    %46 = math.tanh %45 : vector<8x128xf32>
    %47 = arith.mulf %42, %46 : vector<8x128xf32>
    %c0_i32_25 = arith.constant 0 : i32
    %48 = arith.addi %0, %c0_i32_25 : i32
    %49 = vector.broadcast %48 : i32 to vector<8x1xi32>
    %50 = arith.cmpi slt, %49, %4 : vector<8x1xi32>
    %51 = vector.shape_cast %50 : vector<8x1xi1> to vector<8x1xi1>
    %52 = vector.broadcast %51 : vector<8x1xi1> to vector<8x128xi1>
    %53 = arith.select %52, %47, %8 : vector<8x128xi1>, vector<8x128xf32>
    %54 = vector.shape_cast %50 : vector<8x1xi1> to vector<8x1xi1>
    %55 = vector.broadcast %54 : vector<8x1xi1> to vector<8x128xi1>
    %56 = arith.select %55, %45, %9 : vector<8x128xi1>, vector<8x128xf32>
    %cst_26 = arith.constant 0.000000e+00 : f32
    %57 = vector.shape_cast %50 : vector<8x1xi1> to vector<8x1xi1>
    %58 = vector.broadcast %57 : vector<8x1xi1> to vector<8x128xi1>
    %59 = vector.broadcast %cst_26 : f32 to vector<8x128xf32>
    %60 = arith.select %58, %47, %59 : vector<8x128xi1>, vector<8x128xf32>
    %c0_27 = arith.constant 0 : index
    %c0_28 = arith.constant 0 : index
    %c0_29 = arith.constant 0 : index
    %61 = vector.load %arg7[%c0_27, %c0_28, %c0_29] : memref<8x8x128xf32, #tpu.memory_space<vmem>>, vector<8x1x128xf32>
    %62 = vector.shape_cast %61 : vector<8x1x128xf32> to vector<8x128xf32>
    %63 = vector.shape_cast %60 : vector<8x128xf32> to vector<8x1x128xf32>
    tpu.vector_store %arg7[%c0_27, %c0_28, %c0_29], %63 {strides = array<i32>} : memref<8x8x128xf32, #tpu.memory_space<vmem>>, vector<8x1x128xf32>,
    %c1 = arith.constant 1 : index
    %c0_30 = arith.constant 0 : index
    %c0_31 = arith.constant 0 : index
    %64 = vector.load %arg3[%c1, %c0_30, %c0_31] : memref<8x8x16xf32, #tpu.memory_space<vmem>>, vector<1x8x16xf32>
    %65 = vector.shape_cast %64 : vector<1x8x16xf32> to vector<8x16xf32>
    %cst_32 = arith.constant dense<0.000000e+00> : vector<8x512xf32>
    %66 = tpu.matmul %65, %6, %cst_32 {dimension_numbers = #tpu.dot_dimension_numbers<[1], [0], [0], [1], [0, 0, 1, 1], [], []>} : vector<8x16xf32>, vector<16x512xf32>, vector<8x512xf32> -> vector<8x512xf32>
    %cst_33 = arith.constant dense<0.000000e+00> : vector<8x512xf32>
    %67 = tpu.matmul %53, %7, %cst_33 {dimension_numbers = #tpu.dot_dimension_numbers<[1], [0], [0], [1], [0, 0, 1, 1], [], []>} : vector<8x128xf32>, vector<128x512xf32>, vector<8x512xf32> -> vector<8x512xf32>
    %68 = arith.addf %66, %67 : vector<8x512xf32>
    %69 = vector.broadcast %5 : vector<1x512xf32> to vector<8x512xf32>
    %70 = arith.addf %68, %69 : vector<8x512xf32>
    %71 = vector.extract_strided_slice %70 {offsets = [0, 0], sizes = [8, 128], strides = [1, 1]} : vector<8x512xf32> to vector<8x128xf32>
    %cst_34 = arith.constant 5.000000e-01 : f32
    %72 = vector.broadcast %cst_34 : f32 to vector<8x128xf32>
    %73 = arith.mulf %72, %71 : vector<8x128xf32>
    %74 = math.tanh %73 : vector<8x128xf32>
    %cst_35 = arith.constant 5.000000e-01 : f32
    %75 = vector.broadcast %cst_35 : f32 to vector<8x128xf32>
    %76 = arith.mulf %75, %74 : vector<8x128xf32>
    %cst_36 = arith.constant 5.000000e-01 : f32
    %77 = vector.broadcast %cst_36 : f32 to vector<8x128xf32>
    %78 = arith.addf %76, %77 : vector<8x128xf32>
    %79 = vector.extract_strided_slice %70 {offsets = [0, 128], sizes = [8, 128], strides = [1, 1]} : vector<8x512xf32> to vector<8x128xf32>
    %cst_37 = arith.constant 5.000000e-01 : f32
    %80 = vector.broadcast %cst_37 : f32 to vector<8x128xf32>
    %81 = arith.mulf %80, %79 : vector<8x128xf32>
    %82 = math.tanh %81 : vector<8x128xf32>
    %cst_38 = arith.constant 5.000000e-01 : f32
    %83 = vector.broadcast %cst_38 : f32 to vector<8x128xf32>
    %84 = arith.mulf %83, %82 : vector<8x128xf32>
    %cst_39 = arith.constant 5.000000e-01 : f32
    %85 = vector.broadcast %cst_39 : f32 to vector<8x128xf32>
    %86 = arith.addf %84, %85 : vector<8x128xf32>
    %87 = vector.extract_strided_slice %70 {offsets = [0, 256], sizes = [8, 128], strides = [1, 1]} : vector<8x512xf32> to vector<8x128xf32>
    %88 = math.tanh %87 : vector<8x128xf32>
    %89 = vector.extract_strided_slice %70 {offsets = [0, 384], sizes = [8, 128], strides = [1, 1]} : vector<8x512xf32> to vector<8x128xf32>
    %cst_40 = arith.constant 5.000000e-01 : f32
    %90 = vector.broadcast %cst_40 : f32 to vector<8x128xf32>
    %91 = arith.mulf %90, %89 : vector<8x128xf32>
    %92 = math.tanh %91 : vector<8x128xf32>
    %cst_41 = arith.constant 5.000000e-01 : f32
    %93 = vector.broadcast %cst_41 : f32 to vector<8x128xf32>
    %94 = arith.mulf %93, %92 : vector<8x128xf32>
    %cst_42 = arith.constant 5.000000e-01 : f32
    %95 = vector.broadcast %cst_42 : f32 to vector<8x128xf32>
    %96 = arith.addf %94, %95 : vector<8x128xf32>
    %97 = arith.mulf %86, %56 : vector<8x128xf32>
    %98 = arith.mulf %78, %88 : vector<8x128xf32>
    %99 = arith.addf %97, %98 : vector<8x128xf32>
    %100 = math.tanh %99 : vector<8x128xf32>
    %101 = arith.mulf %96, %100 : vector<8x128xf32>
    %c1_i32 = arith.constant 1 : i32
    %102 = arith.addi %0, %c1_i32 : i32
    %103 = vector.broadcast %102 : i32 to vector<8x1xi32>
    %104 = arith.cmpi slt, %103, %4 : vector<8x1xi32>
    %105 = vector.shape_cast %104 : vector<8x1xi1> to vector<8x1xi1>
    %106 = vector.broadcast %105 : vector<8x1xi1> to vector<8x128xi1>
    %107 = arith.select %106, %101, %53 : vector<8x128xi1>, vector<8x128xf32>
    %108 = vector.shape_cast %104 : vector<8x1xi1> to vector<8x1xi1>
    %109 = vector.broadcast %108 : vector<8x1xi1> to vector<8x128xi1>
    %110 = arith.select %109, %99, %56 : vector<8x128xi1>, vector<8x128xf32>
    %cst_43 = arith.constant 0.000000e+00 : f32
    %111 = vector.shape_cast %104 : vector<8x1xi1> to vector<8x1xi1>
    %112 = vector.broadcast %111 : vector<8x1xi1> to vector<8x128xi1>
    %113 = vector.broadcast %cst_43 : f32 to vector<8x128xf32>
    %114 = arith.select %112, %101, %113 : vector<8x128xi1>, vector<8x128xf32>
    %c0_44 = arith.constant 0 : index
    %c1_45 = arith.constant 1 : index
    %c0_46 = arith.constant 0 : index
    %115 = vector.load %arg7[%c0_44, %c1_45, %c0_46] : memref<8x8x128xf32, #tpu.memory_space<vmem>>, vector<8x1x128xf32>
    %116 = vector.shape_cast %115 : vector<8x1x128xf32> to vector<8x128xf32>
    %117 = vector.shape_cast %114 : vector<8x128xf32> to vector<8x1x128xf32>
    tpu.vector_store %arg7[%c0_44, %c1_45, %c0_46], %117 {strides = array<i32>} : memref<8x8x128xf32, #tpu.memory_space<vmem>>, vector<8x1x128xf32>,
    %c2 = arith.constant 2 : index
    %c0_47 = arith.constant 0 : index
    %c0_48 = arith.constant 0 : index
    %118 = vector.load %arg3[%c2, %c0_47, %c0_48] : memref<8x8x16xf32, #tpu.memory_space<vmem>>, vector<1x8x16xf32>
    %119 = vector.shape_cast %118 : vector<1x8x16xf32> to vector<8x16xf32>
    %cst_49 = arith.constant dense<0.000000e+00> : vector<8x512xf32>
    %120 = tpu.matmul %119, %6, %cst_49 {dimension_numbers = #tpu.dot_dimension_numbers<[1], [0], [0], [1], [0, 0, 1, 1], [], []>} : vector<8x16xf32>, vector<16x512xf32>, vector<8x512xf32> -> vector<8x512xf32>
    %cst_50 = arith.constant dense<0.000000e+00> : vector<8x512xf32>
    %121 = tpu.matmul %107, %7, %cst_50 {dimension_numbers = #tpu.dot_dimension_numbers<[1], [0], [0], [1], [0, 0, 1, 1], [], []>} : vector<8x128xf32>, vector<128x512xf32>, vector<8x512xf32> -> vector<8x512xf32>
    %122 = arith.addf %120, %121 : vector<8x512xf32>
    %123 = vector.broadcast %5 : vector<1x512xf32> to vector<8x512xf32>
    %124 = arith.addf %122, %123 : vector<8x512xf32>
    %125 = vector.extract_strided_slice %124 {offsets = [0, 0], sizes = [8, 128], strides = [1, 1]} : vector<8x512xf32> to vector<8x128xf32>
    %cst_51 = arith.constant 5.000000e-01 : f32
    %126 = vector.broadcast %cst_51 : f32 to vector<8x128xf32>
    %127 = arith.mulf %126, %125 : vector<8x128xf32>
    %128 = math.tanh %127 : vector<8x128xf32>
    %cst_52 = arith.constant 5.000000e-01 : f32
    %129 = vector.broadcast %cst_52 : f32 to vector<8x128xf32>
    %130 = arith.mulf %129, %128 : vector<8x128xf32>
    %cst_53 = arith.constant 5.000000e-01 : f32
    %131 = vector.broadcast %cst_53 : f32 to vector<8x128xf32>
    %132 = arith.addf %130, %131 : vector<8x128xf32>
    %133 = vector.extract_strided_slice %124 {offsets = [0, 128], sizes = [8, 128], strides = [1, 1]} : vector<8x512xf32> to vector<8x128xf32>
    %cst_54 = arith.constant 5.000000e-01 : f32
    %134 = vector.broadcast %cst_54 : f32 to vector<8x128xf32>
    %135 = arith.mulf %134, %133 : vector<8x128xf32>
    %136 = math.tanh %135 : vector<8x128xf32>
    %cst_55 = arith.constant 5.000000e-01 : f32
    %137 = vector.broadcast %cst_55 : f32 to vector<8x128xf32>
    %138 = arith.mulf %137, %136 : vector<8x128xf32>
    %cst_56 = arith.constant 5.000000e-01 : f32
    %139 = vector.broadcast %cst_56 : f32 to vector<8x128xf32>
    %140 = arith.addf %138, %139 : vector<8x128xf32>
    %141 = vector.extract_strided_slice %124 {offsets = [0, 256], sizes = [8, 128], strides = [1, 1]} : vector<8x512xf32> to vector<8x128xf32>
    %142 = math.tanh %141 : vector<8x128xf32>
    %143 = vector.extract_strided_slice %124 {offsets = [0, 384], sizes = [8, 128], strides = [1, 1]} : vector<8x512xf32> to vector<8x128xf32>
    %cst_57 = arith.constant 5.000000e-01 : f32
    %144 = vector.broadcast %cst_57 : f32 to vector<8x128xf32>
    %145 = arith.mulf %144, %143 : vector<8x128xf32>
    %146 = math.tanh %145 : vector<8x128xf32>
    %cst_58 = arith.constant 5.000000e-01 : f32
    %147 = vector.broadcast %cst_58 : f32 to vector<8x128xf32>
    %148 = arith.mulf %147, %146 : vector<8x128xf32>
    %cst_59 = arith.constant 5.000000e-01 : f32
    %149 = vector.broadcast %cst_59 : f32 to vector<8x128xf32>
    %150 = arith.addf %148, %149 : vector<8x128xf32>
    %151 = arith.mulf %140, %110 : vector<8x128xf32>
    %152 = arith.mulf %132, %142 : vector<8x128xf32>
    %153 = arith.addf %151, %152 : vector<8x128xf32>
    %154 = math.tanh %153 : vector<8x128xf32>
    %155 = arith.mulf %150, %154 : vector<8x128xf32>
    %c2_i32 = arith.constant 2 : i32
    %156 = arith.addi %0, %c2_i32 : i32
    %157 = vector.broadcast %156 : i32 to vector<8x1xi32>
    %158 = arith.cmpi slt, %157, %4 : vector<8x1xi32>
    %159 = vector.shape_cast %158 : vector<8x1xi1> to vector<8x1xi1>
    %160 = vector.broadcast %159 : vector<8x1xi1> to vector<8x128xi1>
    %161 = arith.select %160, %155, %107 : vector<8x128xi1>, vector<8x128xf32>
    %162 = vector.shape_cast %158 : vector<8x1xi1> to vector<8x1xi1>
    %163 = vector.broadcast %162 : vector<8x1xi1> to vector<8x128xi1>
    %164 = arith.select %163, %153, %110 : vector<8x128xi1>, vector<8x128xf32>
    %cst_60 = arith.constant 0.000000e+00 : f32
    %165 = vector.shape_cast %158 : vector<8x1xi1> to vector<8x1xi1>
    %166 = vector.broadcast %165 : vector<8x1xi1> to vector<8x128xi1>
    %167 = vector.broadcast %cst_60 : f32 to vector<8x128xf32>
    %168 = arith.select %166, %155, %167 : vector<8x128xi1>, vector<8x128xf32>
    %c0_61 = arith.constant 0 : index
    %c2_62 = arith.constant 2 : index
    %c0_63 = arith.constant 0 : index
    %169 = vector.load %arg7[%c0_61, %c2_62, %c0_63] : memref<8x8x128xf32, #tpu.memory_space<vmem>>, vector<8x1x128xf32>
    %170 = vector.shape_cast %169 : vector<8x1x128xf32> to vector<8x128xf32>
    %171 = vector.shape_cast %168 : vector<8x128xf32> to vector<8x1x128xf32>
    tpu.vector_store %arg7[%c0_61, %c2_62, %c0_63], %171 {strides = array<i32>} : memref<8x8x128xf32, #tpu.memory_space<vmem>>, vector<8x1x128xf32>,
    %c3 = arith.constant 3 : index
    %c0_64 = arith.constant 0 : index
    %c0_65 = arith.constant 0 : index
    %172 = vector.load %arg3[%c3, %c0_64, %c0_65] : memref<8x8x16xf32, #tpu.memory_space<vmem>>, vector<1x8x16xf32>
    %173 = vector.shape_cast %172 : vector<1x8x16xf32> to vector<8x16xf32>
    %cst_66 = arith.constant dense<0.000000e+00> : vector<8x512xf32>
    %174 = tpu.matmul %173, %6, %cst_66 {dimension_numbers = #tpu.dot_dimension_numbers<[1], [0], [0], [1], [0, 0, 1, 1], [], []>} : vector<8x16xf32>, vector<16x512xf32>, vector<8x512xf32> -> vector<8x512xf32>
    %cst_67 = arith.constant dense<0.000000e+00> : vector<8x512xf32>
    %175 = tpu.matmul %161, %7, %cst_67 {dimension_numbers = #tpu.dot_dimension_numbers<[1], [0], [0], [1], [0, 0, 1, 1], [], []>} : vector<8x128xf32>, vector<128x512xf32>, vector<8x512xf32> -> vector<8x512xf32>
    %176 = arith.addf %174, %175 : vector<8x512xf32>
    %177 = vector.broadcast %5 : vector<1x512xf32> to vector<8x512xf32>
    %178 = arith.addf %176, %177 : vector<8x512xf32>
    %179 = vector.extract_strided_slice %178 {offsets = [0, 0], sizes = [8, 128], strides = [1, 1]} : vector<8x512xf32> to vector<8x128xf32>
    %cst_68 = arith.constant 5.000000e-01 : f32
    %180 = vector.broadcast %cst_68 : f32 to vector<8x128xf32>
    %181 = arith.mulf %180, %179 : vector<8x128xf32>
    %182 = math.tanh %181 : vector<8x128xf32>
    %cst_69 = arith.constant 5.000000e-01 : f32
    %183 = vector.broadcast %cst_69 : f32 to vector<8x128xf32>
    %184 = arith.mulf %183, %182 : vector<8x128xf32>
    %cst_70 = arith.constant 5.000000e-01 : f32
    %185 = vector.broadcast %cst_70 : f32 to vector<8x128xf32>
    %186 = arith.addf %184, %185 : vector<8x128xf32>
    %187 = vector.extract_strided_slice %178 {offsets = [0, 128], sizes = [8, 128], strides = [1, 1]} : vector<8x512xf32> to vector<8x128xf32>
    %cst_71 = arith.constant 5.000000e-01 : f32
    %188 = vector.broadcast %cst_71 : f32 to vector<8x128xf32>
    %189 = arith.mulf %188, %187 : vector<8x128xf32>
    %190 = math.tanh %189 : vector<8x128xf32>
    %cst_72 = arith.constant 5.000000e-01 : f32
    %191 = vector.broadcast %cst_72 : f32 to vector<8x128xf32>
    %192 = arith.mulf %191, %190 : vector<8x128xf32>
    %cst_73 = arith.constant 5.000000e-01 : f32
    %193 = vector.broadcast %cst_73 : f32 to vector<8x128xf32>
    %194 = arith.addf %192, %193 : vector<8x128xf32>
    %195 = vector.extract_strided_slice %178 {offsets = [0, 256], sizes = [8, 128], strides = [1, 1]} : vector<8x512xf32> to vector<8x128xf32>
    %196 = math.tanh %195 : vector<8x128xf32>
    %197 = vector.extract_strided_slice %178 {offsets = [0, 384], sizes = [8, 128], strides = [1, 1]} : vector<8x512xf32> to vector<8x128xf32>
    %cst_74 = arith.constant 5.000000e-01 : f32
    %198 = vector.broadcast %cst_74 : f32 to vector<8x128xf32>
    %199 = arith.mulf %198, %197 : vector<8x128xf32>
    %200 = math.tanh %199 : vector<8x128xf32>
    %cst_75 = arith.constant 5.000000e-01 : f32
    %201 = vector.broadcast %cst_75 : f32 to vector<8x128xf32>
    %202 = arith.mulf %201, %200 : vector<8x128xf32>
    %cst_76 = arith.constant 5.000000e-01 : f32
    %203 = vector.broadcast %cst_76 : f32 to vector<8x128xf32>
    %204 = arith.addf %202, %203 : vector<8x128xf32>
    %205 = arith.mulf %194, %164 : vector<8x128xf32>
    %206 = arith.mulf %186, %196 : vector<8x128xf32>
    %207 = arith.addf %205, %206 : vector<8x128xf32>
    %208 = math.tanh %207 : vector<8x128xf32>
    %209 = arith.mulf %204, %208 : vector<8x128xf32>
    %c3_i32 = arith.constant 3 : i32
    %210 = arith.addi %0, %c3_i32 : i32
    %211 = vector.broadcast %210 : i32 to vector<8x1xi32>
    %212 = arith.cmpi slt, %211, %4 : vector<8x1xi32>
    %213 = vector.shape_cast %212 : vector<8x1xi1> to vector<8x1xi1>
    %214 = vector.broadcast %213 : vector<8x1xi1> to vector<8x128xi1>
    %215 = arith.select %214, %209, %161 : vector<8x128xi1>, vector<8x128xf32>
    %216 = vector.shape_cast %212 : vector<8x1xi1> to vector<8x1xi1>
    %217 = vector.broadcast %216 : vector<8x1xi1> to vector<8x128xi1>
    %218 = arith.select %217, %207, %164 : vector<8x128xi1>, vector<8x128xf32>
    %cst_77 = arith.constant 0.000000e+00 : f32
    %219 = vector.shape_cast %212 : vector<8x1xi1> to vector<8x1xi1>
    %220 = vector.broadcast %219 : vector<8x1xi1> to vector<8x128xi1>
    %221 = vector.broadcast %cst_77 : f32 to vector<8x128xf32>
    %222 = arith.select %220, %209, %221 : vector<8x128xi1>, vector<8x128xf32>
    %c0_78 = arith.constant 0 : index
    %c3_79 = arith.constant 3 : index
    %c0_80 = arith.constant 0 : index
    %223 = vector.load %arg7[%c0_78, %c3_79, %c0_80] : memref<8x8x128xf32, #tpu.memory_space<vmem>>, vector<8x1x128xf32>
    %224 = vector.shape_cast %223 : vector<8x1x128xf32> to vector<8x128xf32>
    %225 = vector.shape_cast %222 : vector<8x128xf32> to vector<8x1x128xf32>
    tpu.vector_store %arg7[%c0_78, %c3_79, %c0_80], %225 {strides = array<i32>} : memref<8x8x128xf32, #tpu.memory_space<vmem>>, vector<8x1x128xf32>,
    %c4 = arith.constant 4 : index
    %c0_81 = arith.constant 0 : index
    %c0_82 = arith.constant 0 : index
    %226 = vector.load %arg3[%c4, %c0_81, %c0_82] : memref<8x8x16xf32, #tpu.memory_space<vmem>>, vector<1x8x16xf32>
    %227 = vector.shape_cast %226 : vector<1x8x16xf32> to vector<8x16xf32>
    %cst_83 = arith.constant dense<0.000000e+00> : vector<8x512xf32>
    %228 = tpu.matmul %227, %6, %cst_83 {dimension_numbers = #tpu.dot_dimension_numbers<[1], [0], [0], [1], [0, 0, 1, 1], [], []>} : vector<8x16xf32>, vector<16x512xf32>, vector<8x512xf32> -> vector<8x512xf32>
    %cst_84 = arith.constant dense<0.000000e+00> : vector<8x512xf32>
    %229 = tpu.matmul %215, %7, %cst_84 {dimension_numbers = #tpu.dot_dimension_numbers<[1], [0], [0], [1], [0, 0, 1, 1], [], []>} : vector<8x128xf32>, vector<128x512xf32>, vector<8x512xf32> -> vector<8x512xf32>
    %230 = arith.addf %228, %229 : vector<8x512xf32>
    %231 = vector.broadcast %5 : vector<1x512xf32> to vector<8x512xf32>
    %232 = arith.addf %230, %231 : vector<8x512xf32>
    %233 = vector.extract_strided_slice %232 {offsets = [0, 0], sizes = [8, 128], strides = [1, 1]} : vector<8x512xf32> to vector<8x128xf32>
    %cst_85 = arith.constant 5.000000e-01 : f32
    %234 = vector.broadcast %cst_85 : f32 to vector<8x128xf32>
    %235 = arith.mulf %234, %233 : vector<8x128xf32>
    %236 = math.tanh %235 : vector<8x128xf32>
    %cst_86 = arith.constant 5.000000e-01 : f32
    %237 = vector.broadcast %cst_86 : f32 to vector<8x128xf32>
    %238 = arith.mulf %237, %236 : vector<8x128xf32>
    %cst_87 = arith.constant 5.000000e-01 : f32
    %239 = vector.broadcast %cst_87 : f32 to vector<8x128xf32>
    %240 = arith.addf %238, %239 : vector<8x128xf32>
    %241 = vector.extract_strided_slice %232 {offsets = [0, 128], sizes = [8, 128], strides = [1, 1]} : vector<8x512xf32> to vector<8x128xf32>
    %cst_88 = arith.constant 5.000000e-01 : f32
    %242 = vector.broadcast %cst_88 : f32 to vector<8x128xf32>
    %243 = arith.mulf %242, %241 : vector<8x128xf32>
    %244 = math.tanh %243 : vector<8x128xf32>
    %cst_89 = arith.constant 5.000000e-01 : f32
    %245 = vector.broadcast %cst_89 : f32 to vector<8x128xf32>
    %246 = arith.mulf %245, %244 : vector<8x128xf32>
    %cst_90 = arith.constant 5.000000e-01 : f32
    %247 = vector.broadcast %cst_90 : f32 to vector<8x128xf32>
    %248 = arith.addf %246, %247 : vector<8x128xf32>
    %249 = vector.extract_strided_slice %232 {offsets = [0, 256], sizes = [8, 128], strides = [1, 1]} : vector<8x512xf32> to vector<8x128xf32>
    %250 = math.tanh %249 : vector<8x128xf32>
    %251 = vector.extract_strided_slice %232 {offsets = [0, 384], sizes = [8, 128], strides = [1, 1]} : vector<8x512xf32> to vector<8x128xf32>
    %cst_91 = arith.constant 5.000000e-01 : f32
    %252 = vector.broadcast %cst_91 : f32 to vector<8x128xf32>
    %253 = arith.mulf %252, %251 : vector<8x128xf32>
    %254 = math.tanh %253 : vector<8x128xf32>
    %cst_92 = arith.constant 5.000000e-01 : f32
    %255 = vector.broadcast %cst_92 : f32 to vector<8x128xf32>
    %256 = arith.mulf %255, %254 : vector<8x128xf32>
    %cst_93 = arith.constant 5.000000e-01 : f32
    %257 = vector.broadcast %cst_93 : f32 to vector<8x128xf32>
    %258 = arith.addf %256, %257 : vector<8x128xf32>
    %259 = arith.mulf %248, %218 : vector<8x128xf32>
    %260 = arith.mulf %240, %250 : vector<8x128xf32>
    %261 = arith.addf %259, %260 : vector<8x128xf32>
    %262 = math.tanh %261 : vector<8x128xf32>
    %263 = arith.mulf %258, %262 : vector<8x128xf32>
    %c4_i32 = arith.constant 4 : i32
    %264 = arith.addi %0, %c4_i32 : i32
    %265 = vector.broadcast %264 : i32 to vector<8x1xi32>
    %266 = arith.cmpi slt, %265, %4 : vector<8x1xi32>
    %267 = vector.shape_cast %266 : vector<8x1xi1> to vector<8x1xi1>
    %268 = vector.broadcast %267 : vector<8x1xi1> to vector<8x128xi1>
    %269 = arith.select %268, %263, %215 : vector<8x128xi1>, vector<8x128xf32>
    %270 = vector.shape_cast %266 : vector<8x1xi1> to vector<8x1xi1>
    %271 = vector.broadcast %270 : vector<8x1xi1> to vector<8x128xi1>
    %272 = arith.select %271, %261, %218 : vector<8x128xi1>, vector<8x128xf32>
    %cst_94 = arith.constant 0.000000e+00 : f32
    %273 = vector.shape_cast %266 : vector<8x1xi1> to vector<8x1xi1>
    %274 = vector.broadcast %273 : vector<8x1xi1> to vector<8x128xi1>
    %275 = vector.broadcast %cst_94 : f32 to vector<8x128xf32>
    %276 = arith.select %274, %263, %275 : vector<8x128xi1>, vector<8x128xf32>
    %c0_95 = arith.constant 0 : index
    %c4_96 = arith.constant 4 : index
    %c0_97 = arith.constant 0 : index
    %277 = vector.load %arg7[%c0_95, %c4_96, %c0_97] : memref<8x8x128xf32, #tpu.memory_space<vmem>>, vector<8x1x128xf32>
    %278 = vector.shape_cast %277 : vector<8x1x128xf32> to vector<8x128xf32>
    %279 = vector.shape_cast %276 : vector<8x128xf32> to vector<8x1x128xf32>
    tpu.vector_store %arg7[%c0_95, %c4_96, %c0_97], %279 {strides = array<i32>} : memref<8x8x128xf32, #tpu.memory_space<vmem>>, vector<8x1x128xf32>,
    %c5 = arith.constant 5 : index
    %c0_98 = arith.constant 0 : index
    %c0_99 = arith.constant 0 : index
    %280 = vector.load %arg3[%c5, %c0_98, %c0_99] : memref<8x8x16xf32, #tpu.memory_space<vmem>>, vector<1x8x16xf32>
    %281 = vector.shape_cast %280 : vector<1x8x16xf32> to vector<8x16xf32>
    %cst_100 = arith.constant dense<0.000000e+00> : vector<8x512xf32>
    %282 = tpu.matmul %281, %6, %cst_100 {dimension_numbers = #tpu.dot_dimension_numbers<[1], [0], [0], [1], [0, 0, 1, 1], [], []>} : vector<8x16xf32>, vector<16x512xf32>, vector<8x512xf32> -> vector<8x512xf32>
    %cst_101 = arith.constant dense<0.000000e+00> : vector<8x512xf32>
    %283 = tpu.matmul %269, %7, %cst_101 {dimension_numbers = #tpu.dot_dimension_numbers<[1], [0], [0], [1], [0, 0, 1, 1], [], []>} : vector<8x128xf32>, vector<128x512xf32>, vector<8x512xf32> -> vector<8x512xf32>
    %284 = arith.addf %282, %283 : vector<8x512xf32>
    %285 = vector.broadcast %5 : vector<1x512xf32> to vector<8x512xf32>
    %286 = arith.addf %284, %285 : vector<8x512xf32>
    %287 = vector.extract_strided_slice %286 {offsets = [0, 0], sizes = [8, 128], strides = [1, 1]} : vector<8x512xf32> to vector<8x128xf32>
    %cst_102 = arith.constant 5.000000e-01 : f32
    %288 = vector.broadcast %cst_102 : f32 to vector<8x128xf32>
    %289 = arith.mulf %288, %287 : vector<8x128xf32>
    %290 = math.tanh %289 : vector<8x128xf32>
    %cst_103 = arith.constant 5.000000e-01 : f32
    %291 = vector.broadcast %cst_103 : f32 to vector<8x128xf32>
    %292 = arith.mulf %291, %290 : vector<8x128xf32>
    %cst_104 = arith.constant 5.000000e-01 : f32
    %293 = vector.broadcast %cst_104 : f32 to vector<8x128xf32>
    %294 = arith.addf %292, %293 : vector<8x128xf32>
    %295 = vector.extract_strided_slice %286 {offsets = [0, 128], sizes = [8, 128], strides = [1, 1]} : vector<8x512xf32> to vector<8x128xf32>
    %cst_105 = arith.constant 5.000000e-01 : f32
    %296 = vector.broadcast %cst_105 : f32 to vector<8x128xf32>
    %297 = arith.mulf %296, %295 : vector<8x128xf32>
    %298 = math.tanh %297 : vector<8x128xf32>
    %cst_106 = arith.constant 5.000000e-01 : f32
    %299 = vector.broadcast %cst_106 : f32 to vector<8x128xf32>
    %300 = arith.mulf %299, %298 : vector<8x128xf32>
    %cst_107 = arith.constant 5.000000e-01 : f32
    %301 = vector.broadcast %cst_107 : f32 to vector<8x128xf32>
    %302 = arith.addf %300, %301 : vector<8x128xf32>
    %303 = vector.extract_strided_slice %286 {offsets = [0, 256], sizes = [8, 128], strides = [1, 1]} : vector<8x512xf32> to vector<8x128xf32>
    %304 = math.tanh %303 : vector<8x128xf32>
    %305 = vector.extract_strided_slice %286 {offsets = [0, 384], sizes = [8, 128], strides = [1, 1]} : vector<8x512xf32> to vector<8x128xf32>
    %cst_108 = arith.constant 5.000000e-01 : f32
    %306 = vector.broadcast %cst_108 : f32 to vector<8x128xf32>
    %307 = arith.mulf %306, %305 : vector<8x128xf32>
    %308 = math.tanh %307 : vector<8x128xf32>
    %cst_109 = arith.constant 5.000000e-01 : f32
    %309 = vector.broadcast %cst_109 : f32 to vector<8x128xf32>
    %310 = arith.mulf %309, %308 : vector<8x128xf32>
    %cst_110 = arith.constant 5.000000e-01 : f32
    %311 = vector.broadcast %cst_110 : f32 to vector<8x128xf32>
    %312 = arith.addf %310, %311 : vector<8x128xf32>
    %313 = arith.mulf %302, %272 : vector<8x128xf32>
    %314 = arith.mulf %294, %304 : vector<8x128xf32>
    %315 = arith.addf %313, %314 : vector<8x128xf32>
    %316 = math.tanh %315 : vector<8x128xf32>
    %317 = arith.mulf %312, %316 : vector<8x128xf32>
    %c5_i32 = arith.constant 5 : i32
    %318 = arith.addi %0, %c5_i32 : i32
    %319 = vector.broadcast %318 : i32 to vector<8x1xi32>
    %320 = arith.cmpi slt, %319, %4 : vector<8x1xi32>
    %321 = vector.shape_cast %320 : vector<8x1xi1> to vector<8x1xi1>
    %322 = vector.broadcast %321 : vector<8x1xi1> to vector<8x128xi1>
    %323 = arith.select %322, %317, %269 : vector<8x128xi1>, vector<8x128xf32>
    %324 = vector.shape_cast %320 : vector<8x1xi1> to vector<8x1xi1>
    %325 = vector.broadcast %324 : vector<8x1xi1> to vector<8x128xi1>
    %326 = arith.select %325, %315, %272 : vector<8x128xi1>, vector<8x128xf32>
    %cst_111 = arith.constant 0.000000e+00 : f32
    %327 = vector.shape_cast %320 : vector<8x1xi1> to vector<8x1xi1>
    %328 = vector.broadcast %327 : vector<8x1xi1> to vector<8x128xi1>
    %329 = vector.broadcast %cst_111 : f32 to vector<8x128xf32>
    %330 = arith.select %328, %317, %329 : vector<8x128xi1>, vector<8x128xf32>
    %c0_112 = arith.constant 0 : index
    %c5_113 = arith.constant 5 : index
    %c0_114 = arith.constant 0 : index
    %331 = vector.load %arg7[%c0_112, %c5_113, %c0_114] : memref<8x8x128xf32, #tpu.memory_space<vmem>>, vector<8x1x128xf32>
    %332 = vector.shape_cast %331 : vector<8x1x128xf32> to vector<8x128xf32>
    %333 = vector.shape_cast %330 : vector<8x128xf32> to vector<8x1x128xf32>
    tpu.vector_store %arg7[%c0_112, %c5_113, %c0_114], %333 {strides = array<i32>} : memref<8x8x128xf32, #tpu.memory_space<vmem>>, vector<8x1x128xf32>,
    %c6 = arith.constant 6 : index
    %c0_115 = arith.constant 0 : index
    %c0_116 = arith.constant 0 : index
    %334 = vector.load %arg3[%c6, %c0_115, %c0_116] : memref<8x8x16xf32, #tpu.memory_space<vmem>>, vector<1x8x16xf32>
    %335 = vector.shape_cast %334 : vector<1x8x16xf32> to vector<8x16xf32>
    %cst_117 = arith.constant dense<0.000000e+00> : vector<8x512xf32>
    %336 = tpu.matmul %335, %6, %cst_117 {dimension_numbers = #tpu.dot_dimension_numbers<[1], [0], [0], [1], [0, 0, 1, 1], [], []>} : vector<8x16xf32>, vector<16x512xf32>, vector<8x512xf32> -> vector<8x512xf32>
    %cst_118 = arith.constant dense<0.000000e+00> : vector<8x512xf32>
    %337 = tpu.matmul %323, %7, %cst_118 {dimension_numbers = #tpu.dot_dimension_numbers<[1], [0], [0], [1], [0, 0, 1, 1], [], []>} : vector<8x128xf32>, vector<128x512xf32>, vector<8x512xf32> -> vector<8x512xf32>
    %338 = arith.addf %336, %337 : vector<8x512xf32>
    %339 = vector.broadcast %5 : vector<1x512xf32> to vector<8x512xf32>
    %340 = arith.addf %338, %339 : vector<8x512xf32>
    %341 = vector.extract_strided_slice %340 {offsets = [0, 0], sizes = [8, 128], strides = [1, 1]} : vector<8x512xf32> to vector<8x128xf32>
    %cst_119 = arith.constant 5.000000e-01 : f32
    %342 = vector.broadcast %cst_119 : f32 to vector<8x128xf32>
    %343 = arith.mulf %342, %341 : vector<8x128xf32>
    %344 = math.tanh %343 : vector<8x128xf32>
    %cst_120 = arith.constant 5.000000e-01 : f32
    %345 = vector.broadcast %cst_120 : f32 to vector<8x128xf32>
    %346 = arith.mulf %345, %344 : vector<8x128xf32>
    %cst_121 = arith.constant 5.000000e-01 : f32
    %347 = vector.broadcast %cst_121 : f32 to vector<8x128xf32>
    %348 = arith.addf %346, %347 : vector<8x128xf32>
    %349 = vector.extract_strided_slice %340 {offsets = [0, 128], sizes = [8, 128], strides = [1, 1]} : vector<8x512xf32> to vector<8x128xf32>
    %cst_122 = arith.constant 5.000000e-01 : f32
    %350 = vector.broadcast %cst_122 : f32 to vector<8x128xf32>
    %351 = arith.mulf %350, %349 : vector<8x128xf32>
    %352 = math.tanh %351 : vector<8x128xf32>
    %cst_123 = arith.constant 5.000000e-01 : f32
    %353 = vector.broadcast %cst_123 : f32 to vector<8x128xf32>
    %354 = arith.mulf %353, %352 : vector<8x128xf32>
    %cst_124 = arith.constant 5.000000e-01 : f32
    %355 = vector.broadcast %cst_124 : f32 to vector<8x128xf32>
    %356 = arith.addf %354, %355 : vector<8x128xf32>
    %357 = vector.extract_strided_slice %340 {offsets = [0, 256], sizes = [8, 128], strides = [1, 1]} : vector<8x512xf32> to vector<8x128xf32>
    %358 = math.tanh %357 : vector<8x128xf32>
    %359 = vector.extract_strided_slice %340 {offsets = [0, 384], sizes = [8, 128], strides = [1, 1]} : vector<8x512xf32> to vector<8x128xf32>
    %cst_125 = arith.constant 5.000000e-01 : f32
    %360 = vector.broadcast %cst_125 : f32 to vector<8x128xf32>
    %361 = arith.mulf %360, %359 : vector<8x128xf32>
    %362 = math.tanh %361 : vector<8x128xf32>
    %cst_126 = arith.constant 5.000000e-01 : f32
    %363 = vector.broadcast %cst_126 : f32 to vector<8x128xf32>
    %364 = arith.mulf %363, %362 : vector<8x128xf32>
    %cst_127 = arith.constant 5.000000e-01 : f32
    %365 = vector.broadcast %cst_127 : f32 to vector<8x128xf32>
    %366 = arith.addf %364, %365 : vector<8x128xf32>
    %367 = arith.mulf %356, %326 : vector<8x128xf32>
    %368 = arith.mulf %348, %358 : vector<8x128xf32>
    %369 = arith.addf %367, %368 : vector<8x128xf32>
    %370 = math.tanh %369 : vector<8x128xf32>
    %371 = arith.mulf %366, %370 : vector<8x128xf32>
    %c6_i32 = arith.constant 6 : i32
    %372 = arith.addi %0, %c6_i32 : i32
    %373 = vector.broadcast %372 : i32 to vector<8x1xi32>
    %374 = arith.cmpi slt, %373, %4 : vector<8x1xi32>
    %375 = vector.shape_cast %374 : vector<8x1xi1> to vector<8x1xi1>
    %376 = vector.broadcast %375 : vector<8x1xi1> to vector<8x128xi1>
    %377 = arith.select %376, %371, %323 : vector<8x128xi1>, vector<8x128xf32>
    %378 = vector.shape_cast %374 : vector<8x1xi1> to vector<8x1xi1>
    %379 = vector.broadcast %378 : vector<8x1xi1> to vector<8x128xi1>
    %380 = arith.select %379, %369, %326 : vector<8x128xi1>, vector<8x128xf32>
    %cst_128 = arith.constant 0.000000e+00 : f32
    %381 = vector.shape_cast %374 : vector<8x1xi1> to vector<8x1xi1>
    %382 = vector.broadcast %381 : vector<8x1xi1> to vector<8x128xi1>
    %383 = vector.broadcast %cst_128 : f32 to vector<8x128xf32>
    %384 = arith.select %382, %371, %383 : vector<8x128xi1>, vector<8x128xf32>
    %c0_129 = arith.constant 0 : index
    %c6_130 = arith.constant 6 : index
    %c0_131 = arith.constant 0 : index
    %385 = vector.load %arg7[%c0_129, %c6_130, %c0_131] : memref<8x8x128xf32, #tpu.memory_space<vmem>>, vector<8x1x128xf32>
    %386 = vector.shape_cast %385 : vector<8x1x128xf32> to vector<8x128xf32>
    %387 = vector.shape_cast %384 : vector<8x128xf32> to vector<8x1x128xf32>
    tpu.vector_store %arg7[%c0_129, %c6_130, %c0_131], %387 {strides = array<i32>} : memref<8x8x128xf32, #tpu.memory_space<vmem>>, vector<8x1x128xf32>,
    %c7 = arith.constant 7 : index
    %c0_132 = arith.constant 0 : index
    %c0_133 = arith.constant 0 : index
    %388 = vector.load %arg3[%c7, %c0_132, %c0_133] : memref<8x8x16xf32, #tpu.memory_space<vmem>>, vector<1x8x16xf32>
    %389 = vector.shape_cast %388 : vector<1x8x16xf32> to vector<8x16xf32>
    %cst_134 = arith.constant dense<0.000000e+00> : vector<8x512xf32>
    %390 = tpu.matmul %389, %6, %cst_134 {dimension_numbers = #tpu.dot_dimension_numbers<[1], [0], [0], [1], [0, 0, 1, 1], [], []>} : vector<8x16xf32>, vector<16x512xf32>, vector<8x512xf32> -> vector<8x512xf32>
    %cst_135 = arith.constant dense<0.000000e+00> : vector<8x512xf32>
    %391 = tpu.matmul %377, %7, %cst_135 {dimension_numbers = #tpu.dot_dimension_numbers<[1], [0], [0], [1], [0, 0, 1, 1], [], []>} : vector<8x128xf32>, vector<128x512xf32>, vector<8x512xf32> -> vector<8x512xf32>
    %392 = arith.addf %390, %391 : vector<8x512xf32>
    %393 = vector.broadcast %5 : vector<1x512xf32> to vector<8x512xf32>
    %394 = arith.addf %392, %393 : vector<8x512xf32>
    %395 = vector.extract_strided_slice %394 {offsets = [0, 0], sizes = [8, 128], strides = [1, 1]} : vector<8x512xf32> to vector<8x128xf32>
    %cst_136 = arith.constant 5.000000e-01 : f32
    %396 = vector.broadcast %cst_136 : f32 to vector<8x128xf32>
    %397 = arith.mulf %396, %395 : vector<8x128xf32>
    %398 = math.tanh %397 : vector<8x128xf32>
    %cst_137 = arith.constant 5.000000e-01 : f32
    %399 = vector.broadcast %cst_137 : f32 to vector<8x128xf32>
    %400 = arith.mulf %399, %398 : vector<8x128xf32>
    %cst_138 = arith.constant 5.000000e-01 : f32
    %401 = vector.broadcast %cst_138 : f32 to vector<8x128xf32>
    %402 = arith.addf %400, %401 : vector<8x128xf32>
    %403 = vector.extract_strided_slice %394 {offsets = [0, 128], sizes = [8, 128], strides = [1, 1]} : vector<8x512xf32> to vector<8x128xf32>
    %cst_139 = arith.constant 5.000000e-01 : f32
    %404 = vector.broadcast %cst_139 : f32 to vector<8x128xf32>
    %405 = arith.mulf %404, %403 : vector<8x128xf32>
    %406 = math.tanh %405 : vector<8x128xf32>
    %cst_140 = arith.constant 5.000000e-01 : f32
    %407 = vector.broadcast %cst_140 : f32 to vector<8x128xf32>
    %408 = arith.mulf %407, %406 : vector<8x128xf32>
    %cst_141 = arith.constant 5.000000e-01 : f32
    %409 = vector.broadcast %cst_141 : f32 to vector<8x128xf32>
    %410 = arith.addf %408, %409 : vector<8x128xf32>
    %411 = vector.extract_strided_slice %394 {offsets = [0, 256], sizes = [8, 128], strides = [1, 1]} : vector<8x512xf32> to vector<8x128xf32>
    %412 = math.tanh %411 : vector<8x128xf32>
    %413 = vector.extract_strided_slice %394 {offsets = [0, 384], sizes = [8, 128], strides = [1, 1]} : vector<8x512xf32> to vector<8x128xf32>
    %cst_142 = arith.constant 5.000000e-01 : f32
    %414 = vector.broadcast %cst_142 : f32 to vector<8x128xf32>
    %415 = arith.mulf %414, %413 : vector<8x128xf32>
    %416 = math.tanh %415 : vector<8x128xf32>
    %cst_143 = arith.constant 5.000000e-01 : f32
    %417 = vector.broadcast %cst_143 : f32 to vector<8x128xf32>
    %418 = arith.mulf %417, %416 : vector<8x128xf32>
    %cst_144 = arith.constant 5.000000e-01 : f32
    %419 = vector.broadcast %cst_144 : f32 to vector<8x128xf32>
    %420 = arith.addf %418, %419 : vector<8x128xf32>
    %421 = arith.mulf %410, %380 : vector<8x128xf32>
    %422 = arith.mulf %402, %412 : vector<8x128xf32>
    %423 = arith.addf %421, %422 : vector<8x128xf32>
    %424 = math.tanh %423 : vector<8x128xf32>
    %425 = arith.mulf %420, %424 : vector<8x128xf32>
    %c7_i32 = arith.constant 7 : i32
    %426 = arith.addi %0, %c7_i32 : i32
    %427 = vector.broadcast %426 : i32 to vector<8x1xi32>
    %428 = arith.cmpi slt, %427, %4 : vector<8x1xi32>
    %429 = vector.shape_cast %428 : vector<8x1xi1> to vector<8x1xi1>
    %430 = vector.broadcast %429 : vector<8x1xi1> to vector<8x128xi1>
    %431 = arith.select %430, %425, %377 : vector<8x128xi1>, vector<8x128xf32>
    %432 = vector.shape_cast %428 : vector<8x1xi1> to vector<8x1xi1>
    %433 = vector.broadcast %432 : vector<8x1xi1> to vector<8x128xi1>
    %434 = arith.select %433, %423, %380 : vector<8x128xi1>, vector<8x128xf32>
    %cst_145 = arith.constant 0.000000e+00 : f32
    %435 = vector.shape_cast %428 : vector<8x1xi1> to vector<8x1xi1>
    %436 = vector.broadcast %435 : vector<8x1xi1> to vector<8x128xi1>
    %437 = vector.broadcast %cst_145 : f32 to vector<8x128xf32>
    %438 = arith.select %436, %425, %437 : vector<8x128xi1>, vector<8x128xf32>
    %c0_146 = arith.constant 0 : index
    %c7_147 = arith.constant 7 : index
    %c0_148 = arith.constant 0 : index
    %439 = vector.load %arg7[%c0_146, %c7_147, %c0_148] : memref<8x8x128xf32, #tpu.memory_space<vmem>>, vector<8x1x128xf32>
    %440 = vector.shape_cast %439 : vector<8x1x128xf32> to vector<8x128xf32>
    %441 = vector.shape_cast %438 : vector<8x128xf32> to vector<8x1x128xf32>
    tpu.vector_store %arg7[%c0_146, %c7_147, %c0_148], %441 {strides = array<i32>} : memref<8x8x128xf32, #tpu.memory_space<vmem>>, vector<8x1x128xf32>,
    %c0_149 = arith.constant 0 : index
    %c0_150 = arith.constant 0 : index
    %442 = vector.load %arg8[%c0_149, %c0_150] : memref<8x128xf32, #tpu.memory_space<vmem>>, vector<8x128xf32>
    tpu.vector_store %arg8[%c0_149, %c0_150], %431 {strides = array<i32>} : memref<8x128xf32, #tpu.memory_space<vmem>>, vector<8x128xf32>,
    %c0_151 = arith.constant 0 : index
    %c0_152 = arith.constant 0 : index
    %443 = vector.load %arg9[%c0_151, %c0_152] : memref<8x128xf32, #tpu.memory_space<vmem>>, vector<8x128xf32>
    tpu.vector_store %arg9[%c0_151, %c0_152], %434 {strides = array<i32>} : memref<8x128xf32, #tpu.memory_space<vmem>>, vector<8x128xf32>,
    return
  }
  func.func @transform_0(%arg0: i32, %arg1: i32) -> (i32, i32) {
    %c0_i32 = arith.constant 0 : i32
    %c0_i32_0 = arith.constant 0 : i32
    return %arg0, %c0_i32 : i32, i32
  }
  func.func @transform_1(%arg0: i32, %arg1: i32) -> (i32, i32, i32) {
    %c0_i32 = arith.constant 0 : i32
    %c0_i32_0 = arith.constant 0 : i32
    return %arg1, %arg0, %c0_i32 : i32, i32, i32
  }
  func.func @transform_2(%arg0: i32, %arg1: i32) -> (i32, i32) {
    %c0_i32 = arith.constant 0 : i32
    %c0_i32_0 = arith.constant 0 : i32
    %c0_i32_1 = arith.constant 0 : i32
    return %c0_i32, %c0_i32_0 : i32, i32
  }
  func.func @transform_3(%arg0: i32, %arg1: i32) -> (i32, i32) {
    %c0_i32 = arith.constant 0 : i32
    %c0_i32_0 = arith.constant 0 : i32
    %c0_i32_1 = arith.constant 0 : i32
    return %c0_i32, %c0_i32_0 : i32, i32
  }
  func.func @transform_4(%arg0: i32, %arg1: i32) -> (i32, i32) {
    %c0_i32 = arith.constant 0 : i32
    %c0_i32_0 = arith.constant 0 : i32
    %c0_i32_1 = arith.constant 0 : i32
    return %c0_i32, %c0_i32_0 : i32, i32
  }
  func.func @transform_5(%arg0: i32, %arg1: i32) -> (i32, i32, i32) {
    %c0_i32 = arith.constant 0 : i32
    %c0_i32_0 = arith.constant 0 : i32
    return %arg0, %arg1, %c0_i32 : i32, i32, i32
  }
  func.func @transform_6(%arg0: i32, %arg1: i32) -> (i32, i32) {
    %c0_i32 = arith.constant 0 : i32
    %c0_i32_0 = arith.constant 0 : i32
    return %arg0, %c0_i32 : i32, i32
  }
  func.func @transform_7(%arg0: i32, %arg1: i32) -> (i32, i32) {
    %c0_i32 = arith.constant 0 : i32
    %c0_i32_0 = arith.constant 0 : i32
    return %arg0, %c0_i32 : i32, i32
  }
}

</mosaic_0001>

<bundles_post_ra>
// kernel: tpu_custom_call.1
= control target key start
LH: loop header
LB: loop body
LE: loop exit
PB: predicated region body
PF: predicated region fallthrough
CT: control target
= control target key end

     0   :  { %13 = vsyncpa [#allocation3], 0  ;;  %s4959_s0 = inlined_call_operand.vmem [shape: s32[8,1], index: 0, kind: input, shape index: {}]   ;;  %s4960_s1 = inlined_call_operand.hbm [shape: f32[8,8,16], index: 1, kind: input, shape index: {}]   ;;  %s4961_s2 = inlined_call_operand.hbm [shape: f32[16,512], index: 2, kind: input, shape index: {}]   ;;  %s4962_s3 = inlined_call_operand.hbm [shape: f32[128,512], index: 3, kind: input, shape index: {}]   ;;  %s4963_s4 = inlined_call_operand.vmem [shape: f32[1,512], index: 4, kind: input, shape index: {}]   ;;  %s4964_s5 = inlined_call_operand.hbm [shape: f32[8,8,128], index: 5, kind: output, shape index: {0}]   ;;  %s4965_s6 = inlined_call_operand.hbm [shape: f32[8,128], index: 6, kind: output, shape index: {1}]   ;;  %s4966_s7 = inlined_call_operand.hbm [shape: f32[8,128], index: 7, kind: output, shape index: {2}]  }
   0x1   :  { %14 = vsyncpa [#allocation6], 0 }
   0x2   :  { %15 = vsyncpa [#allocation4], 0 }
   0x3   :  { %16 = vsyncpa [#allocation10], 0  ;;  %s4221_s24 = smov [#allocation5]   ;;  %s4081_s28 = scalar_lea.hbm %s4961_s2, 1024 }
   0x4   :  { %s36_s25 = sshll.u32 %s4221_s24, 4  ;;  %p4082_p0 = scmp.ne.s32.totalorder %s4961_s2, %s4081_s28  ;;  %s37_s25 = int_to_ptr.vmem [resolvable:$true] %s36_s25 }
   0x5   :  { %p4085_p1 = scmp.lt.u32.totalorder %s4081_s28, %s4961_s2 }
   0x7   :  { %p4087_p2 = pnand %p4085_p1, %p4082_p0 }
   0x9   :  { %4090 = shalt.err (!%p4087_p2)
}
   0xa   :  { %s4091_s10 = scalar_lea.vmem %s37_s25, 1024  ;;  %p4096_p4 = scmp.lt.s32.totalorder %s37_s25, %s37_s25 }
   0xb   :  { %p4092_p3 = scmp.ne.s32.totalorder %s37_s25, %s4091_s10  ;;  %p4097_p5 = scmp.lt.s32.totalorder %s4091_s10, %s4091_s10 }
   0xd   :  { %p4098_p6 = por %p4097_p5, %p4096_p4 }
   0xf   :  { %p4099_p7 = pnand %p4098_p6, %p4092_p3 }
  0x11   :  { %4102 = shalt.err (!%p4099_p7)
}
  0x12   :  { %s4222_s11 = smov 512   ;;  %s4223_s12 = smov 32  }
  0x13   :  { %42 = dma.hbm_to_vmem [thread:$0]  %s4961_s2, 1024, %s37_s25, [#allocation6], %s4222_s11, %s4222_s11, %s4223_s12  }
  0x14   :  { %s4224_s15 = smov [#allocation2]   ;;  %s4103_s19 = scalar_lea.hbm %s4960_s1, 1024 }
  0x15   :  { %s24_s16 = sshll.u32 %s4224_s15, 4  ;;  %p4104_p8 = scmp.ne.s32.totalorder %s4960_s1, %s4103_s19  ;;  %s25_s16 = int_to_ptr.vmem [resolvable:$true] %s24_s16 }
  0x16   :  { %p4107_p9 = scmp.lt.u32.totalorder %s4103_s19, %s4960_s1 }
  0x18   :  { %p4109_p10 = pnand %p4107_p9, %p4104_p8 }
  0x1a   :  { %4112 = shalt.err (!%p4109_p10)
}
  0x1b   :  { %s4113_s24 = scalar_lea.vmem %s25_s16, 1024  ;;  %p4118_p12 = scmp.lt.s32.totalorder %s25_s16, %s25_s16 }
  0x1c   :  { %p4114_p11 = scmp.ne.s32.totalorder %s25_s16, %s4113_s24  ;;  %p4119_p13 = scmp.lt.s32.totalorder %s4113_s24, %s4113_s24 }
  0x1e   :  { %p4120_p0 = por %p4119_p13, %p4118_p12 }
  0x20   :  { %p4121_p1 = pnand %p4120_p0, %p4114_p11 }
  0x22   :  { %4124 = shalt.err (!%p4121_p1)
}
  0x23   :  { %s4225_s2 = smov 128   ;;  %s4226_s25 = smov 8  }
  0x24   :  { %30 = dma.hbm_to_vmem [thread:$0]  %s4960_s1, 1024, %s25_s16, [#allocation3], %s4225_s2, %s4225_s2, %s4226_s25  }
  0x25   :  { %s4227_s28 = smov [#allocation7]   ;;  %s4125_s9 = scalar_lea.hbm %s4962_s3, 8192 }
  0x26   :  { %s48_s29 = sshll.u32 %s4227_s28, 4  ;;  %p4126_p2 = scmp.ne.s32.totalorder %s4962_s3, %s4125_s9  ;;  %s49_s29 = int_to_ptr.vmem [resolvable:$true] %s48_s29 }
  0x27   :  { %p4129_p3 = scmp.lt.u32.totalorder %s4125_s9, %s4962_s3 }
  0x29   :  { %p4131_p4 = pnand %p4129_p3, %p4126_p2 }
  0x2b   :  { %4134 = shalt.err (!%p4131_p4)
}
  0x2c   :  { %s4135_s17 = scalar_lea.vmem %s49_s29, 8192  ;;  %p4140_p6 = scmp.lt.s32.totalorder %s49_s29, %s49_s29 }
  0x2d   :  { %p4136_p5 = scmp.ne.s32.totalorder %s49_s29, %s4135_s17  ;;  %p4141_p7 = scmp.lt.s32.totalorder %s4135_s17, %s4135_s17 }
  0x2f   :  { %p4142_p8 = por %p4141_p7, %p4140_p6 }
  0x31   :  { %p4143_p9 = pnand %p4142_p8, %p4136_p5 }
  0x33   :  { %4146 = shalt.err (!%p4143_p9)
}
  0x34   :  { %54 = dma.hbm_to_vmem [thread:$0]  %s4962_s3, 8192, %s49_s29, [#allocation6], %s4222_s11, %s4222_s11, %s4223_s12  }
  0x35   :  { %4213 = dma.done.wait [#allocation3], 1024  }
  0x36   :  { %4214 = vsyncadd [#allocation3], 4294966272 }
  0x37   :  { %4215 = dma.done.wait [#allocation6], 9216  }
  0x38   :  { %4216 = vsyncadd [#allocation6], 4294958080  ;;  %v4228_v0 = vmov 0.0   ;;  %v4229_v1 = vmov 0   ;;  %v84_v2 = vld [vmem:[#allocation7 + $0x8] sm:$0xff]  ;;  %v86_v4 = vld [vmem:[#allocation7 + $0x18] sm:$0xff] }
  0x39   :  { %214 = vmatprep.mubr.f32.mxu0 %v4228_v0  ;;  %285 = vmatprep.mubr.f32.mxu1 %v4228_v0  ;;  %v88_v3 = vld [vmem:[#allocation7 + $0x28] sm:$0xff]  ;;  %v90_v6 = vld [vmem:[#allocation7 + $0x38] sm:$0xff]  ;;  %v83_v7 = vld [vmem:[#allocation7] sm:$0xff]  ;;  %vm292_vm4 = vcmask 130048   ;;  %s4232_s19 = smov [#allocation11]  }
  0x3a   :  { %3997 = vset.pattern.permute.xlu0 %v4229_v1  ;;  %3998 = vset.pattern.permute.xlu1 %v4229_v1  ;;  %v4323_v5 = vpack.c.bf16 %v88_v3, %v84_v2  ;;  %v87_v8 = vld [vmem:[#allocation7 + $0x20] sm:$0xff]  ;;  %v4325_v9 = vpack.c.bf16 %v90_v6, %v86_v4  ;;  %v85_v11 = vld [vmem:[#allocation7 + $0x10] sm:$0xff]  ;;  %v92_v13 = vld [vmem:[#allocation7 + $0x48] sm:$0xff]  ;;  %s3303_s20 = sshll.u32 %s4232_s19, 4  ;;  %s4907_s20 = int_to_ptr.vmem [resolvable:$true] %s3303_s20 }
  0x3b   :  { %v4327_v10 = vpack.c.bf16 %v87_v8, %v83_v7  ;;  %v89_v12 = vld [vmem:[#allocation7 + $0x30] sm:$0xff]  ;;  %v96_v15 = vld [vmem:[#allocation7 + $0x68] sm:$0xff]  ;;  %v94_v16 = vld [vmem:[#allocation7 + $0x58] sm:$0xff] }
  0x3c   :  { %3377 = vmatprep.subr.bf16.mxu0 %v4323_v5  ;;  %v4330_v14 = vpack.c.bf16 %v89_v12, %v85_v11  ;;  %v98_v17 = vld [vmem:[#allocation7 + $0x78] sm:$0xff]  ;;  %3409 = vmatprep.subr.bf16.mxu1 %v4325_v9  ;;  %v4334_v18 = vpack.c.bf16 %v96_v15, %v92_v13  ;;  %v91_v20 = vld [vmem:[#allocation7 + $0x40] sm:$0xff]  ;;  %v93_v22 = vld [vmem:[#allocation7 + $0x50] sm:$0xff] }
  0x3d   :  { %3379 = vmatpush1.bf16.msra.mxu0 %v4327_v10  ;;  %v4336_v19 = vpack.c.bf16 %v98_v17, %v94_v16  ;;  %v95_v21 = vld [vmem:[#allocation7 + $0x60] sm:$0xff]  ;;  %v97_v24 = vld [vmem:[#allocation7 + $0x70] sm:$0xff]  ;;  %v100_v25 = vld [vmem:[#allocation7 + $0x88] sm:$0xff] }
  0x3e   :  { %3411 = vmatpush1.bf16.msra.mxu1 %v4330_v14  ;;  %v4339_v23 = vpack.c.bf16 %v95_v21, %v91_v20  ;;  %v104_v26 = vld [vmem:[#allocation7 + $0xa8] sm:$0xff]  ;;  %3381 = vmatprep.subr.bf16.mxu0 %v4334_v18  ;;  %v4343_v27 = vpack.c.bf16 %v97_v24, %v93_v22  ;;  %v102_v29 = vld [vmem:[#allocation7 + $0x98] sm:$0xff]  ;;  %v99_v31 = vld [vmem:[#allocation7 + $0x80] sm:$0xff] }
  0x3f   :  { %3413 = vmatprep.subr.bf16.mxu1 %v4336_v19  ;;  %v4345_v28 = vpack.c.bf16 %v104_v26, %v100_v25  ;;  %v106_v30 = vld [vmem:[#allocation7 + $0xb8] sm:$0xff]  ;;  %v103_v33 = vld [vmem:[#allocation7 + $0xa0] sm:$0xff]  ;;  %v101_v34 = vld [vmem:[#allocation7 + $0x90] sm:$0xff] }
  0x40   :  { %v4347_v32 = vpack.c.bf16 %v106_v30, %v102_v29  ;;  %v105_v35 = vld [vmem:[#allocation7 + $0xb0] sm:$0xff]  ;;  %v4350_v36 = vpack.c.bf16 %v103_v33, %v99_v31  ;;  %v108_v37 = vld [vmem:[#allocation7 + $0xc8] sm:$0xff]  ;;  %v110_v39 = vld [vmem:[#allocation7 + $0xd8] sm:$0xff] }
  0x41   :  { %3383 = vmatpush1.bf16.msra.mxu0 %v4339_v23  ;;  %v112_v38 = vld [vmem:[#allocation7 + $0xe8] sm:$0xff]  ;;  %v4354_v40 = vpack.c.bf16 %v105_v35, %v101_v34  ;;  %v114_v42 = vld [vmem:[#allocation7 + $0xf8] sm:$0xff]  ;;  %v107_v43 = vld [vmem:[#allocation7 + $0xc0] sm:$0xff] }
  0x42   :  { %3415 = vmatpush1.bf16.msra.mxu1 %v4343_v27  ;;  %3385 = vmatprep.subr.bf16.mxu0 %v4345_v28  ;;  %v4356_v41 = vpack.c.bf16 %v112_v38, %v108_v37  ;;  %v111_v44 = vld [vmem:[#allocation7 + $0xe0] sm:$0xff]  ;;  %v4359_v45 = vpack.c.bf16 %v114_v42, %v110_v39  ;;  %v109_v46 = vld [vmem:[#allocation7 + $0xd0] sm:$0xff]  ;;  %v116_v48 = vld [vmem:[#allocation7 + $0x108] sm:$0xff] }
  0x43   :  { %3417 = vmatprep.subr.bf16.mxu1 %v4347_v32  ;;  %v113_v47 = vld [vmem:[#allocation7 + $0xf0] sm:$0xff]  ;;  %v120_v49 = vld [vmem:[#allocation7 + $0x128] sm:$0xff]  ;;  %v118_v50 = vld [vmem:[#allocation7 + $0x118] sm:$0xff]  ;;  %v4362_v52 = vpack.c.bf16 %v111_v44, %v107_v43 }
  0x44   :  { %v122_v51 = vld [vmem:[#allocation7 + $0x138] sm:$0xff]  ;;  %v4366_v53 = vpack.c.bf16 %v113_v47, %v109_v46  ;;  %v4368_v54 = vpack.c.bf16 %v120_v49, %v116_v48  ;;  %v115_v55 = vld [vmem:[#allocation7 + $0x100] sm:$0xff]  ;;  %v117_v57 = vld [vmem:[#allocation7 + $0x110] sm:$0xff] }
  0x45   :  { %3387 = vmatpush1.bf16.msra.mxu0 %v4350_v36  ;;  %v119_v56 = vld [vmem:[#allocation7 + $0x120] sm:$0xff]  ;;  %v4371_v58 = vpack.c.bf16 %v122_v51, %v118_v50  ;;  %v121_v59 = vld [vmem:[#allocation7 + $0x130] sm:$0xff]  ;;  %v124_v60 = vld [vmem:[#allocation7 + $0x148] sm:$0xff] }
  0x46   :  { %3419 = vmatpush1.bf16.msra.mxu1 %v4354_v40  ;;  %3389 = vmatprep.subr.bf16.mxu0 %v4356_v41  ;;  %v128_v61 = vld [vmem:[#allocation7 + $0x168] sm:$0xff]  ;;  %v126_v62 = vld [vmem:[#allocation7 + $0x158] sm:$0xff]  ;;  %v4374_v2 = vpack.c.bf16 %v119_v56, %v115_v55  ;;  %v4378_v3 = vpack.c.bf16 %v121_v59, %v117_v57  ;;  %v123_v6 = vld [vmem:[#allocation7 + $0x140] sm:$0xff] }
  0x47   :  { %3421 = vmatprep.subr.bf16.mxu1 %v4359_v45  ;;  %v130_v63 = vld [vmem:[#allocation7 + $0x178] sm:$0xff]  ;;  %v4380_v4 = vpack.c.bf16 %v128_v61, %v124_v60  ;;  %v127_v7 = vld [vmem:[#allocation7 + $0x160] sm:$0xff]  ;;  %v125_v8 = vld [vmem:[#allocation7 + $0x150] sm:$0xff] }
  0x48   :  { %v4383_v11 = vpack.c.bf16 %v130_v63, %v126_v62  ;;  %v129_v12 = vld [vmem:[#allocation7 + $0x170] sm:$0xff]  ;;  %v132_v13 = vld [vmem:[#allocation7 + $0x188] sm:$0xff]  ;;  %v134_v16 = vld [vmem:[#allocation7 + $0x198] sm:$0xff]  ;;  %v4386_v20 = vpack.c.bf16 %v127_v7, %v123_v6 }
  0x49   :  { %3391 = vmatpush1.bf16.msra.mxu0 %v4362_v52  ;;  %v136_v15 = vld [vmem:[#allocation7 + $0x1a8] sm:$0xff]  ;;  %v138_v17 = vld [vmem:[#allocation7 + $0x1b8] sm:$0xff]  ;;  %v4390_v21 = vpack.c.bf16 %v129_v12, %v125_v8  ;;  %v131_v24 = vld [vmem:[#allocation7 + $0x180] sm:$0xff] }
  0x4a   :  { %3423 = vmatpush1.bf16.msra.mxu1 %v4366_v53  ;;  %3393 = vmatprep.subr.bf16.mxu0 %v4368_v54  ;;  %v4392_v22 = vpack.c.bf16 %v136_v15, %v132_v13  ;;  %v135_v25 = vld [vmem:[#allocation7 + $0x1a0] sm:$0xff]  ;;  %v133_v26 = vld [vmem:[#allocation7 + $0x190] sm:$0xff]  ;;  %v4395_v29 = vpack.c.bf16 %v138_v17, %v134_v16  ;;  %v140_v31 = vld [vmem:[#allocation7 + $0x1c8] sm:$0xff] }
  0x4b   :  { %3425 = vmatprep.subr.bf16.mxu1 %v4371_v58  ;;  %v137_v30 = vld [vmem:[#allocation7 + $0x1b0] sm:$0xff]  ;;  %v144_v33 = vld [vmem:[#allocation7 + $0x1e8] sm:$0xff]  ;;  %v142_v34 = vld [vmem:[#allocation7 + $0x1d8] sm:$0xff]  ;;  %v4398_v37 = vpack.c.bf16 %v135_v25, %v131_v24  ;;  %v439_v24 = vlaneseq }
  0x4c   :  { %v146_v35 = vld [vmem:[#allocation7 + $0x1f8] sm:$0xff]  ;;  %v4403_v38 = vld [vmem:[%s4959_s0] sm:$0xff]  ;;  %v4407_v39 = vpack.c.bf16 %v137_v30, %v133_v26  ;;  %v4409_v42 = vpack.c.bf16 %v144_v33, %v140_v31  ;;  %v141_v46 = vld [vmem:[#allocation7 + $0x1d0] sm:$0xff] }
  0x4d   :  { %3395 = vmatpush1.bf16.msra.mxu0 %v4374_v2  ;;  %v139_v43 = vld [vmem:[#allocation7 + $0x1c0] sm:$0xff]  ;;  %vm3322_vm0 = vcmp.gt.s32.totalorder %v4403_v38, 0  ;;  %vm3329_vm1 = vcmp.gt.s32.totalorder %v4403_v38, 1  ;;  %v4414_v47 = vpack.c.bf16 %v146_v35, %v142_v34  ;;  %v145_v48 = vld [vmem:[#allocation7 + $0x1f0] sm:$0xff]  ;;  %v76_v49 = vld [vmem:[#allocation5 + $0x8] sm:$0xff]  ;;  %vm3350_vm2 = vcmp.gt.s32.totalorder %v4403_v38, 4 }
  0x4e   :  { %3427 = vmatpush1.bf16.msra.mxu1 %v4378_v3  ;;  %3397 = vmatprep.subr.bf16.mxu0 %v4380_v4  ;;  %v143_v44 = vld [vmem:[#allocation7 + $0x1e0] sm:$0xff]  ;;  %v80_v50 = vld [vmem:[#allocation5 + $0x28] sm:$0xff]  ;;  %v483_v51 = vsel %vm3322_vm0, 1, %v4229_v1  ;;  %v78_v55 = vld [vmem:[#allocation5 + $0x18] sm:$0xff]  ;;  %v871_v59 = vsel %vm3329_vm1, 1, %v4229_v1  ;;  %v4423_v60 = vpack.c.bf16 %v145_v48, %v141_v46  ;;  %v2035_v13 = vsel %vm3350_vm2, 1, %v4229_v1 }
  0x4f   :  { %3429 = vmatprep.subr.bf16.mxu1 %v4383_v11  ;;  %v82_v56 = vld [vmem:[#allocation5 + $0x38] sm:$0xff]  ;;  %485 = vperm.xlu0 %3997, %v483_v51   ;;  %v4418_v57 = vpack.c.bf16 %v143_v44, %v139_v43  ;;  %v4425_v61 = vpack.c.bf16 %v80_v50, %v76_v49  ;;  %v75_v62 = vld [vmem:[#allocation5] sm:$0xff]  ;;  %v77_v7 = vld [vmem:[#allocation5 + $0x10] sm:$0xff]  ;;  %vm3364_vm3 = vcmp.gt.s32.totalorder %v4403_v38, 6  ;;  %v440_v25 = vshrl.u32 %v439_v24, 7 }
  0x50   :  { %v79_v63 = vld [vmem:[#allocation5 + $0x20] sm:$0xff]  ;;  %v4429_v6 = vpack.c.bf16 %v82_v56, %v78_v55  ;;  %v81_v8 = vld [vmem:[#allocation5 + $0x30] sm:$0xff]  ;;  %v2811_v16 = vsel %vm3364_vm3, 1, %v4229_v1  ;;  %vm3336_vm6 = vcmp.gt.s32.totalorder %v4403_v38, 2  ;;  %vm3343_vm7 = vcmp.gt.s32.totalorder %v4403_v38, 3 }
  0x51   :  { %3399 = vmatpush1.bf16.msra.mxu0 %v4386_v20  ;;  %v4432_v12 = vpack.c.bf16 %v79_v63, %v75_v62  ;;  %v4437_v15 = vpack.c.bf16 %v81_v8, %v77_v7  ;;  %v149_v17 = vld [vmem:[#allocation2] sm:$0xff]  ;;  %v441_v26 = vsub.s32 0, %v440_v25  ;;  %v445_v31 = vsub.s32 1, %v440_v25 }
  0x52   :  { %3431 = vmatpush1.bf16.msra.mxu1 %v4390_v21  ;;  %3401 = vmatprep.subr.bf16.mxu0 %v4392_v22  ;;  %v74_v30 = vld [vmem:[%s4963_s4] sm:$0xf]  ;;  %v449_v34 = vsub.s32 2, %v440_v25  ;;  %v453_v50 = vsub.s32 3, %v440_v25  ;;  %vm3357_vm8 = vcmp.gt.s32.totalorder %v4403_v38, 5  ;;  %vm3371_vm9 = vcmp.gt.s32.totalorder %v4403_v38, 7 }
  0x53   :  { %3433 = vmatprep.subr.bf16.mxu1 %v4395_v29  ;;  %873 = vperm.xlu0 %3997, %v871_v59   ;;  %v4489_v33 = vrot.slane %v74_v30, %v441_v26  ;;  %v4491_v35 = vrot.slane %v74_v30, %v445_v31  ;;  %s4231_s4 = smov [#allocation9]  }
  0x54   :  { %v4494_v48 = vrot.slane %v74_v30, %v449_v34  ;;  %v4498_v63 = vrot.slane %v74_v30, %v453_v50  ;;  %s3293_s18 = sshll.u32 %s4231_s4, 4  ;;  %s3294_s18 = int_to_ptr.vmem [resolvable:$true] %s3293_s18 }
  0x55   :  { %3403 = vmatpush1.bf16.msra.mxu0 %v4398_v37  ;;  %s4147_s21 = scalar_lea.vmem %s3294_s18, 128  ;;  %p4152_p11 = scmp.lt.s32.totalorder %s3294_s18, %s3294_s18 }
  0x56   :  { %3435 = vmatpush1.bf16.msra.mxu1 %v4407_v39  ;;  %3405 = vmatprep.subr.bf16.mxu0 %v4409_v42  ;;  %p4148_p10 = scmp.ne.s32.totalorder %s3294_s18, %s4147_s21  ;;  %p4153_p12 = scmp.lt.s32.totalorder %s4147_s21, %s4147_s21 }
  0x57   :  { %3437 = vmatprep.subr.bf16.mxu1 %v4414_v47  ;;  %2037 = vperm.xlu0 %3997, %v2035_v13  }
  0x58   :  { %p4154_p13 = por %p4153_p12, %p4152_p11 }
  0x59   :  { %3407 = vmatpush1.bf16.msra.mxu0 %v4418_v57 }
  0x5a   :  { %3439 = vmatpush1.bf16.msra.mxu1 %v4423_v60  ;;  %3441 = vmatprep.subr.bf16.mxu0 %v4425_v61  ;;  %p4155_p0 = pnand %p4154_p13, %p4148_p10 }
  0x5b   :  { %3445 = vmatprep.subr.bf16.mxu1 %v4429_v6  ;;  %2813 = vperm.xlu0 %3997, %v2811_v16  }
  0x5c   :  { %215 = vmatmul.mubr.f32.vlgmr.msra.gmra.mrb[0].mxu0 %v4228_v0 }
  0x5d   :  { %286 = vmatmul.mubr.f32.vlgmr.msra.gmra.mrb[0].mxu1 %v4228_v0  ;;  %3443 = vmatpush1.bf16.msra.mxu0 %v4432_v12 }
  0x5e   :  { %3447 = vmatpush1.bf16.msra.mxu1 %v4437_v15  ;;  %360 = vmatprep.mubr.f32.mxu0 %v4228_v0 }
  0x5f   :  { %431 = vmatprep.mubr.f32.mxu1 %v4228_v0  ;;  %3449 = vmatprep.subr.bf16.mxu0 %v4323_v5 }
  0x60   :  { %3481 = vmatprep.subr.bf16.mxu1 %v4325_v9 }
  0x64   :  { %3320 = vmatmul.mubr.msk.f32.vlgmr.msra.gmra.mrb[0].mxu0 %vm292_vm4, %v149_v17 }
  0x65   :  { %3321 = vmatmul.mubr.msk.f32.vlgmr.msra.gmra.mrb[0].mxu1 %vm292_vm4, %v149_v17  ;;  %3451 = vmatpush1.bf16.msra.mxu0 %v4327_v10 }
  0x66   :  { %3483 = vmatpush1.bf16.msra.mxu1 %v4330_v14  ;;  %3453 = vmatprep.subr.bf16.mxu0 %v4334_v18 }
  0x67   :  { %3485 = vmatprep.subr.bf16.mxu1 %v4336_v19  ;;  %623 = vmatprep.mubr.f32.mxu0 %v4228_v0 }
  0x68   :  { %694 = vmatprep.mubr.f32.mxu1 %v4228_v0 }
  0x69   :  { %3455 = vmatpush1.bf16.msra.mxu0 %v4339_v23 }
  0x6a   :  { %3487 = vmatpush1.bf16.msra.mxu1 %v4343_v27  ;;  %3457 = vmatprep.subr.bf16.mxu0 %v4345_v28 }
  0x6b   :  { %3489 = vmatprep.subr.bf16.mxu1 %v4347_v32 }
  0x6d   :  { %3459 = vmatpush1.bf16.msra.mxu0 %v4350_v36 }
  0x6e   :  { %3491 = vmatpush1.bf16.msra.mxu1 %v4354_v40  ;;  %3461 = vmatprep.subr.bf16.mxu0 %v4356_v41 }
  0x6f   :  { %3493 = vmatprep.subr.bf16.mxu1 %v4359_v45 }
  0x71   :  { %3463 = vmatpush1.bf16.msra.mxu0 %v4362_v52 }
  0x72   :  { %3495 = vmatpush1.bf16.msra.mxu1 %v4366_v53  ;;  %3465 = vmatprep.subr.bf16.mxu0 %v4368_v54 }
  0x73   :  { %3497 = vmatprep.subr.bf16.mxu1 %v4371_v58 }
  0x75   :  { %3467 = vmatpush1.bf16.msra.mxu0 %v4374_v2 }
  0x76   :  { %3499 = vmatpush1.bf16.msra.mxu1 %v4378_v3  ;;  %3469 = vmatprep.subr.bf16.mxu0 %v4380_v4 }
  0x77   :  { %3501 = vmatprep.subr.bf16.mxu1 %v4383_v11 }
  0x79   :  { %3471 = vmatpush1.bf16.msra.mxu0 %v4386_v20 }
  0x7a   :  { %3503 = vmatpush1.bf16.msra.mxu1 %v4390_v21  ;;  %3473 = vmatprep.subr.bf16.mxu0 %v4392_v22 }
  0x7b   :  { %3505 = vmatprep.subr.bf16.mxu1 %v4395_v29 }
  0x7d   :  { %3475 = vmatpush1.bf16.msra.mxu0 %v4398_v37 }
  0x7e   :  { %3507 = vmatpush1.bf16.msra.mxu1 %v4407_v39  ;;  %3477 = vmatprep.subr.bf16.mxu0 %v4409_v42 }
  0x7f   :  { %3509 = vmatprep.subr.bf16.mxu1 %v4414_v47 }
  0x81   :  { %3479 = vmatpush1.bf16.msra.mxu0 %v4418_v57 }
  0x82   :  { %3511 = vmatpush1.bf16.msra.mxu1 %v4423_v60  ;;  %3513 = vmatprep.subr.bf16.mxu0 %v4425_v61 }
  0x83   :  { %3517 = vmatprep.subr.bf16.mxu1 %v4429_v6 }
 0x137   :  { %v362_v43 = vpop.f32.mrb[0].mxu0 }
 0x138   :  { %v459_v44 = vadd.f32 %v4489_v33, %v362_v43  ;;  %v433_v46 = vpop.f32.mrb[0].mxu1  ;;  %v364_v49 = vpop.f32.mrb[1].mxu0 }
 0x139   :  { %v460_v51 = vadd.f32 %v4491_v35, %v364_v49  ;;  %v435_v55 = vpop.f32.mrb[1].mxu1  ;;  %v461_v62 = vadd.f32 %v4494_v48, %v433_v46  ;;  %v486_v43 = vpop.permute.xlu0 %485 }
 0x13a   :  { %v463_v56 = vmul.f32 0.5, %v459_v44  ;;  %v462_v7 = vadd.f32 %v4498_v63, %v435_v55  ;;  %vm487_vm5 = vcmp.eq.s32.totalorder %v486_v43, 1 }
 0x13b   :  { %v467_v59 = vmul.f32 0.5, %v460_v51  ;;  %v4230_v51 = vmov 1966171168  }
 0x13c   :  { %3999 = vtanh.f32 %v463_v56  ;;  %v472_v8 = vmul.f32 0.5, %v462_v7  ;;  %v494_v55 = vunpack.c.l.s4 %v4230_v51 }
 0x13d   :  { %4001 = vtanh.f32 %v467_v59 }
 0x13e   :  { %4003 = vtanh.f32 %v461_v62  ;;  %v495_v59 = vunpack.c.0.s8 %v494_v55 }
 0x13f   :  { %4005 = vtanh.f32 %v472_v8 }
 0x140   :  { %v4504_v8 = vsub.s32 %v495_v59, %v440_v25  ;;  %v1259_v59 = vsel %vm3336_vm6, 1, %v4229_v1 }
 0x141   :  { %1261 = vperm.xlu1 %3998, %v1259_v59  }
 0x146   :  { %v4000_v13 = vpop.eup %3999 }
 0x147   :  { %v4002_v16 = vpop.eup %4001  ;;  %v465_v17 = vmul.f32 0.5, %v4000_v13 }
 0x148   :  { %v469_v24 = vmul.f32 0.5, %v4002_v16  ;;  %v4004_v31 = vpop.eup %4003 }
 0x149   :  { %v466_v26 = vadd.f32 0.5, %v465_v17  ;;  %v4006_v50 = vpop.eup %4005 }
 0x14a   :  { %v470_v34 = vadd.f32 0.5, %v469_v24  ;;  %v474_v56 = vmul.f32 0.5, %v4006_v50 }
 0x14b   :  { %v477_v44 = vmul.f32 %v4004_v31, %v466_v26 }
 0x14c   :  { %v476_v49 = vmul.f32 0.0, %v470_v34  ;;  %v475_v62 = vadd.f32 0.5, %v474_v56 }
 0x14e   :  { %v478_v46 = vadd.f32 %v477_v44, %v476_v49 }
 0x150   :  { %4007 = vtanh.f32 %v478_v46  ;;  %v4502_v30 = vsel %vm487_vm5, %v478_v46, 0.0  ;;  %v558_v46 = vld [vmem:[#allocation2 + $0x8] sm:$0xff] }
 0x15a   :  { %v4008_v7 = vpop.eup %4007 }
 0x15b   :  { %v480_v13 = vmul.f32 %v4008_v7, %v475_v62  ;;  %v1647_v62 = vsel %vm3343_vm7, 1, %v4229_v1  ;;  %v2423_v7 = vsel %vm3357_vm8, 1, %v4229_v1 }
 0x15c   :  { %1649 = vperm.xlu1 %3998, %v1647_v62  }
 0x15d   :  { %v4507_v16 = vsel %vm487_vm5, %v480_v13, 0.0  ;;  %4079 = vmatmul.mubr.msk.f32.vlgmr.msra.gmra.mrb[2].mxu0 %vm487_vm5, %v480_v13  ;;  %4080 = vmatmul.mubr.msk.f32.vlgmr.msra.gmra.mrb[2].mxu1 %vm487_vm5, %v480_v13  ;;  %v3199_v13 = vsel %vm3371_vm9, 1, %v4229_v1 }
 0x15e   :  { %v492_v17 = vcombine.high %v4507_v16, %v4507_v16  ;;  %v499_v24 = vrot.slane %v4507_v16, %v4504_v8  ;;  %3515 = vmatpush1.bf16.msra.mxu0 %v4432_v12  ;;  %3519 = vmatpush1.bf16.msra.mxu1 %v4437_v15 }
 0x15f   :  { %768 = vmatprep.mubr.f32.mxu0 %v4228_v0  ;;  %839 = vmatprep.mubr.f32.mxu1 %v4228_v0 }
 0x160   :  { %v506_v25 = vrot.slane %v492_v17, %v4504_v8  ;;  %v507_v26 = vcombine.high %v499_v24, %v499_v24  ;;  %v515_v31 = vrot.slane %v499_v24, %v4504_v8  ;;  %3323 = vst.sshfl [vmem:[#allocation8] sm:$0x1 pattern:$0x73625140] %v499_v24  ;;  %3521 = vmatprep.subr.bf16.mxu0 %v4323_v5 }
 0x161   :  { %3553 = vmatprep.subr.bf16.mxu1 %v4325_v9  ;;  %2425 = vperm.xlu1 %3998, %v2423_v7  }
 0x162   :  { %v508_v34 = vcombine.high %v506_v25, %v506_v25  ;;  %v522_v43 = vrot.slane %v506_v25, %v4504_v8  ;;  %v529_v44 = vrot.slane %v507_v26, %v4504_v8  ;;  %v537_v49 = vcombine.high %v515_v31, %v515_v31  ;;  %3324 = vst.sshfl [vmem:[#allocation8 + $0x8] sm:$0x1 pattern:$0x73625140] %v507_v26 }
 0x163   :  { %3325 = vst.sshfl [vmem:[#allocation8 + $0x20] sm:$0x1 pattern:$0x73625140] %v506_v25 }
 0x164   :  { %v536_v50 = vrot.slane %v508_v34, %v4504_v8  ;;  %v538_v51 = vcombine.high %v522_v43, %v522_v43  ;;  %v539_v55 = vcombine.high %v529_v44, %v529_v44  ;;  %551 = vst [vmem:[#allocation8 + $0x10] sm:$0x1] %v537_v49  ;;  %3326 = vst.sshfl [vmem:[#allocation8 + $0x28] sm:$0x1 pattern:$0x73625140] %v508_v34 }
 0x165   :  { %3327 = vmatmul.mubr.msk.f32.vlgmr.msra.gmra.mrb[2].mxu0 %vm292_vm4, %v558_v46  ;;  %3328 = vmatmul.mubr.msk.f32.vlgmr.msra.gmra.mrb[2].mxu1 %vm292_vm4, %v558_v46 }
 0x166   :  { %v540_v56 = vcombine.high %v536_v50, %v536_v50  ;;  %552 = vst [vmem:[#allocation8 + $0x18] sm:$0x1] %v539_v55  ;;  %555 = vst [vmem:[#allocation8 + $0x30] sm:$0x1] %v538_v51  ;;  %3523 = vmatpush1.bf16.msra.mxu0 %v4327_v10  ;;  %3555 = vmatpush1.bf16.msra.mxu1 %v4330_v14 }
 0x167   :  { %3525 = vmatprep.subr.bf16.mxu0 %v4334_v18  ;;  %3557 = vmatprep.subr.bf16.mxu1 %v4336_v19 }
 0x168   :  { %556 = vst [vmem:[#allocation8 + $0x38] sm:$0x1] %v540_v56  ;;  %1011 = vmatprep.mubr.f32.mxu0 %v4228_v0  ;;  %1082 = vmatprep.mubr.f32.mxu1 %v4228_v0 }
 0x169   :  { %3201 = vperm.xlu1 %3998, %v3199_v13  }
 0x16a   :  { %3527 = vmatpush1.bf16.msra.mxu0 %v4339_v23  ;;  %3559 = vmatpush1.bf16.msra.mxu1 %v4343_v27 }
 0x16b   :  { %3529 = vmatprep.subr.bf16.mxu0 %v4345_v28  ;;  %3561 = vmatprep.subr.bf16.mxu1 %v4347_v32 }
 0x16e   :  { %3531 = vmatpush1.bf16.msra.mxu0 %v4350_v36  ;;  %3563 = vmatpush1.bf16.msra.mxu1 %v4354_v40 }
 0x16f   :  { %3533 = vmatprep.subr.bf16.mxu0 %v4356_v41  ;;  %3565 = vmatprep.subr.bf16.mxu1 %v4359_v45 }
 0x172   :  { %3535 = vmatpush1.bf16.msra.mxu0 %v4362_v52  ;;  %3567 = vmatpush1.bf16.msra.mxu1 %v4366_v53 }
 0x173   :  { %3537 = vmatprep.subr.bf16.mxu0 %v4368_v54  ;;  %3569 = vmatprep.subr.bf16.mxu1 %v4371_v58 }
 0x176   :  { %3539 = vmatpush1.bf16.msra.mxu0 %v4374_v2  ;;  %3571 = vmatpush1.bf16.msra.mxu1 %v4378_v3 }
 0x177   :  { %3541 = vmatprep.subr.bf16.mxu0 %v4380_v4  ;;  %3573 = vmatprep.subr.bf16.mxu1 %v4383_v11 }
 0x17a   :  { %3543 = vmatpush1.bf16.msra.mxu0 %v4386_v20  ;;  %3575 = vmatpush1.bf16.msra.mxu1 %v4390_v21 }
 0x17b   :  { %3545 = vmatprep.subr.bf16.mxu0 %v4392_v22  ;;  %3577 = vmatprep.subr.bf16.mxu1 %v4395_v29 }
 0x17e   :  { %3547 = vmatpush1.bf16.msra.mxu0 %v4398_v37  ;;  %3579 = vmatpush1.bf16.msra.mxu1 %v4407_v39 }
 0x17f   :  { %3549 = vmatprep.subr.bf16.mxu0 %v4409_v42  ;;  %3581 = vmatprep.subr.bf16.mxu1 %v4414_v47 }
 0x182   :  { %3551 = vmatpush1.bf16.msra.mxu0 %v4418_v57  ;;  %3583 = vmatpush1.bf16.msra.mxu1 %v4423_v60 }
 0x183   :  { %3585 = vmatprep.subr.bf16.mxu0 %v4425_v61  ;;  %3589 = vmatprep.subr.bf16.mxu1 %v4429_v6 }
 0x238   :  { %v770_v17 = vpop.f32.mrb[2].mxu0  ;;  %v841_v24 = vpop.f32.mrb[2].mxu1 }
 0x239   :  { %v846_v25 = vadd.f32 %v770_v17, %v4489_v33  ;;  %v772_v26 = vpop.f32.mrb[3].mxu0  ;;  %v843_v31 = vpop.f32.mrb[3].mxu1  ;;  %v848_v49 = vadd.f32 %v841_v24, %v4494_v48 }
 0x23a   :  { %v847_v34 = vadd.f32 %v772_v26, %v4491_v35  ;;  %v849_v38 = vadd.f32 %v843_v31, %v4498_v63  ;;  %v874_v17 = vpop.permute.xlu0 %873 }
 0x23b   :  { %v850_v43 = vmul.f32 0.5, %v846_v25  ;;  %vm875_vm10 = vcmp.eq.s32.totalorder %v874_v17, 1 }
 0x23c   :  { %v854_v44 = vmul.f32 0.5, %v847_v34  ;;  %v859_v46 = vmul.f32 0.5, %v849_v38 }
 0x23d   :  { %4009 = vtanh.f32 %v850_v43 }
 0x23e   :  { %4011 = vtanh.f32 %v854_v44 }
 0x23f   :  { %4013 = vtanh.f32 %v848_v49 }
 0x240   :  { %4015 = vtanh.f32 %v859_v46 }
 0x247   :  { %v4010_v1 = vpop.eup %4009 }
 0x248   :  { %v4012_v50 = vpop.eup %4011  ;;  %v852_v51 = vmul.f32 0.5, %v4010_v1 }
 0x249   :  { %v856_v55 = vmul.f32 0.5, %v4012_v50  ;;  %v4014_v59 = vpop.eup %4013 }
 0x24a   :  { %v853_v56 = vadd.f32 0.5, %v852_v51  ;;  %v4016_v26 = vpop.eup %4015 }
 0x24b   :  { %v857_v62 = vadd.f32 0.5, %v856_v55  ;;  %v861_v31 = vmul.f32 0.5, %v4016_v26 }
 0x24c   :  { %v864_v7 = vmul.f32 %v4014_v59, %v853_v56 }
 0x24d   :  { %v863_v13 = vmul.f32 %v857_v62, %v4502_v30  ;;  %v862_v34 = vadd.f32 0.5, %v861_v31  ;;  %v946_v62 = vld [vmem:[#allocation2 + $0x10] sm:$0xff] }
 0x24f   :  { %v865_v25 = vadd.f32 %v864_v7, %v863_v13 }
 0x251   :  { %4017 = vtanh.f32 %v865_v25  ;;  %v4576_v24 = vsel %vm875_vm10, %v865_v25, %v4502_v30 }
 0x25b   :  { %v4018_v43 = vpop.eup %4017 }
 0x25c   :  { %v867_v44 = vmul.f32 %v4018_v43, %v862_v34 }
 0x25e   :  { %v878_v49 = vsel %vm875_vm10, %v867_v44, 0.0  ;;  %v4579_v38 = vsel %vm875_vm10, %v867_v44, %v4507_v16 }
 0x25f   :  { %v880_v46 = vcombine.high %v878_v49, %v878_v49  ;;  %v887_v1 = vrot.slane %v878_v49, %v4504_v8  ;;  %1012 = vmatmul.mubr.f32.vlgmr.msra.gmra.mrb[4].mxu0 %v4579_v38  ;;  %1083 = vmatmul.mubr.f32.vlgmr.msra.gmra.mrb[4].mxu1 %v4579_v38 }
 0x260   :  { %3587 = vmatpush1.bf16.msra.mxu0 %v4432_v12  ;;  %3591 = vmatpush1.bf16.msra.mxu1 %v4437_v15 }
 0x261   :  { %v894_v30 = vrot.slane %v880_v46, %v4504_v8  ;;  %v895_v50 = vcombine.high %v887_v1, %v887_v1  ;;  %v903_v51 = vrot.slane %v887_v1, %v4504_v8  ;;  %3330 = vst.sshfl [vmem:[#allocation8 + $0x1] sm:$0x1 pattern:$0x73625140] %v887_v1  ;;  %1156 = vmatprep.mubr.f32.mxu0 %v4228_v0 }
 0x262   :  { %1227 = vmatprep.mubr.f32.mxu1 %v4228_v0  ;;  %3593 = vmatprep.subr.bf16.mxu0 %v4323_v5 }
 0x263   :  { %3625 = vmatprep.subr.bf16.mxu1 %v4325_v9  ;;  %v896_v16 = vcombine.high %v894_v30, %v894_v30  ;;  %v910_v55 = vrot.slane %v894_v30, %v4504_v8  ;;  %v917_v56 = vrot.slane %v895_v50, %v4504_v8  ;;  %v925_v59 = vcombine.high %v903_v51, %v903_v51 }
 0x264   :  { %3331 = vst.sshfl [vmem:[#allocation8 + $0x9] sm:$0x1 pattern:$0x73625140] %v895_v50 }
 0x265   :  { %3332 = vst.sshfl [vmem:[#allocation8 + $0x21] sm:$0x1 pattern:$0x73625140] %v894_v30  ;;  %v924_v7 = vrot.slane %v896_v16, %v4504_v8  ;;  %v926_v13 = vcombine.high %v910_v55, %v910_v55  ;;  %v927_v17 = vcombine.high %v917_v56, %v917_v56  ;;  %939 = vst [vmem:[#allocation8 + $0x11] sm:$0x1] %v925_v59 }
 0x266   :  { %3333 = vst.sshfl [vmem:[#allocation8 + $0x29] sm:$0x1 pattern:$0x73625140] %v896_v16 }
 0x267   :  { %v928_v25 = vcombine.high %v924_v7, %v924_v7  ;;  %940 = vst [vmem:[#allocation8 + $0x19] sm:$0x1] %v927_v17  ;;  %943 = vst [vmem:[#allocation8 + $0x31] sm:$0x1] %v926_v13  ;;  %3334 = vmatmul.mubr.msk.f32.vlgmr.msra.gmra.mrb[4].mxu0 %vm292_vm4, %v946_v62  ;;  %3335 = vmatmul.mubr.msk.f32.vlgmr.msra.gmra.mrb[4].mxu1 %vm292_vm4, %v946_v62  ;;  %v1262_v17 = vpop.permute.xlu1 %1261 }
 0x268   :  { %3595 = vmatpush1.bf16.msra.mxu0 %v4327_v10  ;;  %3627 = vmatpush1.bf16.msra.mxu1 %v4330_v14  ;;  %vm1263_vm11 = vcmp.eq.s32.totalorder %v1262_v17, 1 }
 0x269   :  { %944 = vst [vmem:[#allocation8 + $0x39] sm:$0x1] %v928_v25  ;;  %3597 = vmatprep.subr.bf16.mxu0 %v4334_v18  ;;  %3629 = vmatprep.subr.bf16.mxu1 %v4336_v19 }
 0x26a   :  { %1399 = vmatprep.mubr.f32.mxu0 %v4228_v0  ;;  %1470 = vmatprep.mubr.f32.mxu1 %v4228_v0 }
 0x26c   :  { %3599 = vmatpush1.bf16.msra.mxu0 %v4339_v23  ;;  %3631 = vmatpush1.bf16.msra.mxu1 %v4343_v27 }
 0x26d   :  { %3601 = vmatprep.subr.bf16.mxu0 %v4345_v28  ;;  %3633 = vmatprep.subr.bf16.mxu1 %v4347_v32 }
 0x270   :  { %3603 = vmatpush1.bf16.msra.mxu0 %v4350_v36  ;;  %3635 = vmatpush1.bf16.msra.mxu1 %v4354_v40 }
 0x271   :  { %3605 = vmatprep.subr.bf16.mxu0 %v4356_v41  ;;  %3637 = vmatprep.subr.bf16.mxu1 %v4359_v45 }
 0x274   :  { %3607 = vmatpush1.bf16.msra.mxu0 %v4362_v52  ;;  %3639 = vmatpush1.bf16.msra.mxu1 %v4366_v53 }
 0x275   :  { %3609 = vmatprep.subr.bf16.mxu0 %v4368_v54  ;;  %3641 = vmatprep.subr.bf16.mxu1 %v4371_v58 }
 0x278   :  { %3611 = vmatpush1.bf16.msra.mxu0 %v4374_v2  ;;  %3643 = vmatpush1.bf16.msra.mxu1 %v4378_v3 }
 0x279   :  { %3613 = vmatprep.subr.bf16.mxu0 %v4380_v4  ;;  %3645 = vmatprep.subr.bf16.mxu1 %v4383_v11 }
 0x27c   :  { %3615 = vmatpush1.bf16.msra.mxu0 %v4386_v20  ;;  %3647 = vmatpush1.bf16.msra.mxu1 %v4390_v21 }
 0x27d   :  { %3617 = vmatprep.subr.bf16.mxu0 %v4392_v22  ;;  %3649 = vmatprep.subr.bf16.mxu1 %v4395_v29 }
 0x280   :  { %3619 = vmatpush1.bf16.msra.mxu0 %v4398_v37  ;;  %3651 = vmatpush1.bf16.msra.mxu1 %v4407_v39 }
 0x281   :  { %3621 = vmatprep.subr.bf16.mxu0 %v4409_v42  ;;  %3653 = vmatprep.subr.bf16.mxu1 %v4414_v47 }
 0x284   :  { %3623 = vmatpush1.bf16.msra.mxu0 %v4418_v57  ;;  %3655 = vmatpush1.bf16.msra.mxu1 %v4423_v60 }
 0x285   :  { %3657 = vmatprep.subr.bf16.mxu0 %v4425_v61  ;;  %3661 = vmatprep.subr.bf16.mxu1 %v4429_v6 }
 0x33a   :  { %v1158_v26 = vpop.f32.mrb[4].mxu0  ;;  %v1229_v31 = vpop.f32.mrb[4].mxu1 }
 0x33b   :  { %v1234_v34 = vadd.f32 %v1158_v26, %v4489_v33  ;;  %v1160_v43 = vpop.f32.mrb[5].mxu0  ;;  %v1231_v44 = vpop.f32.mrb[5].mxu1  ;;  %v1236_v30 = vadd.f32 %v1229_v31, %v4494_v48 }
 0x33c   :  { %v1235_v49 = vadd.f32 %v1160_v43, %v4491_v35  ;;  %v1237_v50 = vadd.f32 %v1231_v44, %v4498_v63 }
 0x33d   :  { %v1238_v46 = vmul.f32 0.5, %v1234_v34 }
 0x33e   :  { %v1242_v1 = vmul.f32 0.5, %v1235_v49  ;;  %v1247_v51 = vmul.f32 0.5, %v1237_v50 }
 0x33f   :  { %4019 = vtanh.f32 %v1238_v46 }
 0x340   :  { %4021 = vtanh.f32 %v1242_v1 }
 0x341   :  { %4023 = vtanh.f32 %v1236_v30 }
 0x342   :  { %4025 = vtanh.f32 %v1247_v51 }
 0x349   :  { %v4020_v16 = vpop.eup %4019 }
 0x34a   :  { %v4022_v55 = vpop.eup %4021  ;;  %v1240_v56 = vmul.f32 0.5, %v4020_v16 }
 0x34b   :  { %v1244_v59 = vmul.f32 0.5, %v4022_v55  ;;  %v4024_v7 = vpop.eup %4023 }
 0x34c   :  { %v1241_v62 = vadd.f32 0.5, %v1240_v56  ;;  %v4026_v43 = vpop.eup %4025 }
 0x34d   :  { %v1245_v13 = vadd.f32 0.5, %v1244_v59  ;;  %v1249_v44 = vmul.f32 0.5, %v4026_v43 }
 0x34e   :  { %v1252_v25 = vmul.f32 %v4024_v7, %v1241_v62 }
 0x34f   :  { %v1251_v26 = vmul.f32 %v1245_v13, %v4576_v24  ;;  %v1250_v49 = vadd.f32 0.5, %v1249_v44  ;;  %v1334_v13 = vld [vmem:[#allocation2 + $0x18] sm:$0xff] }
 0x351   :  { %v1253_v34 = vadd.f32 %v1252_v25, %v1251_v26 }
 0x353   :  { %4027 = vtanh.f32 %v1253_v34  ;;  %v4637_v31 = vsel %vm1263_vm11, %v1253_v34, %v4576_v24 }
 0x35d   :  { %v4028_v46 = vpop.eup %4027 }
 0x35e   :  { %v1255_v1 = vmul.f32 %v4028_v46, %v1250_v49 }
 0x360   :  { %v4640_v30 = vsel %vm1263_vm11, %v1255_v1, %v4579_v38  ;;  %v1266_v50 = vsel %vm1263_vm11, %v1255_v1, 0.0 }
 0x361   :  { %v1268_v51 = vcombine.high %v1266_v50, %v1266_v50  ;;  %v1275_v16 = vrot.slane %v1266_v50, %v4504_v8  ;;  %1400 = vmatmul.mubr.f32.vlgmr.msra.gmra.mrb[6].mxu0 %v4640_v30  ;;  %1471 = vmatmul.mubr.f32.vlgmr.msra.gmra.mrb[6].mxu1 %v4640_v30 }
 0x362   :  { %3659 = vmatpush1.bf16.msra.mxu0 %v4432_v12  ;;  %3663 = vmatpush1.bf16.msra.mxu1 %v4437_v15 }
 0x363   :  { %v1282_v24 = vrot.slane %v1268_v51, %v4504_v8  ;;  %v1283_v55 = vcombine.high %v1275_v16, %v1275_v16  ;;  %v1291_v56 = vrot.slane %v1275_v16, %v4504_v8  ;;  %3337 = vst.sshfl [vmem:[#allocation8 + $0x2] sm:$0x1 pattern:$0x73625140] %v1275_v16  ;;  %1544 = vmatprep.mubr.f32.mxu0 %v4228_v0 }
 0x364   :  { %1615 = vmatprep.mubr.f32.mxu1 %v4228_v0  ;;  %3665 = vmatprep.subr.bf16.mxu0 %v4323_v5 }
 0x365   :  { %3697 = vmatprep.subr.bf16.mxu1 %v4325_v9  ;;  %v1284_v38 = vcombine.high %v1282_v24, %v1282_v24  ;;  %v1298_v59 = vrot.slane %v1282_v24, %v4504_v8  ;;  %v1305_v62 = vrot.slane %v1283_v55, %v4504_v8  ;;  %v1313_v7 = vcombine.high %v1291_v56, %v1291_v56 }
 0x366   :  { %3338 = vst.sshfl [vmem:[#allocation8 + $0xa] sm:$0x1 pattern:$0x73625140] %v1283_v55 }
 0x367   :  { %3339 = vst.sshfl [vmem:[#allocation8 + $0x22] sm:$0x1 pattern:$0x73625140] %v1282_v24  ;;  %v1312_v17 = vrot.slane %v1284_v38, %v4504_v8  ;;  %v1314_v25 = vcombine.high %v1298_v59, %v1298_v59  ;;  %v1315_v26 = vcombine.high %v1305_v62, %v1305_v62  ;;  %1327 = vst [vmem:[#allocation8 + $0x12] sm:$0x1] %v1313_v7 }
 0x368   :  { %3340 = vst.sshfl [vmem:[#allocation8 + $0x2a] sm:$0x1 pattern:$0x73625140] %v1284_v38 }
 0x369   :  { %v1316_v34 = vcombine.high %v1312_v17, %v1312_v17  ;;  %1328 = vst [vmem:[#allocation8 + $0x1a] sm:$0x1] %v1315_v26  ;;  %1331 = vst [vmem:[#allocation8 + $0x32] sm:$0x1] %v1314_v25  ;;  %3341 = vmatmul.mubr.msk.f32.vlgmr.msra.gmra.mrb[6].mxu0 %vm292_vm4, %v1334_v13  ;;  %3342 = vmatmul.mubr.msk.f32.vlgmr.msra.gmra.mrb[6].mxu1 %vm292_vm4, %v1334_v13 }
 0x36a   :  { %3667 = vmatpush1.bf16.msra.mxu0 %v4327_v10  ;;  %3699 = vmatpush1.bf16.msra.mxu1 %v4330_v14 }
 0x36b   :  { %1332 = vst [vmem:[#allocation8 + $0x3a] sm:$0x1] %v1316_v34  ;;  %3669 = vmatprep.subr.bf16.mxu0 %v4334_v18  ;;  %3701 = vmatprep.subr.bf16.mxu1 %v4336_v19 }
 0x36c   :  { %1787 = vmatprep.mubr.f32.mxu0 %v4228_v0  ;;  %1858 = vmatprep.mubr.f32.mxu1 %v4228_v0 }
 0x36e   :  { %3671 = vmatpush1.bf16.msra.mxu0 %v4339_v23  ;;  %3703 = vmatpush1.bf16.msra.mxu1 %v4343_v27 }
 0x36f   :  { %3673 = vmatprep.subr.bf16.mxu0 %v4345_v28  ;;  %3705 = vmatprep.subr.bf16.mxu1 %v4347_v32 }
 0x372   :  { %3675 = vmatpush1.bf16.msra.mxu0 %v4350_v36  ;;  %3707 = vmatpush1.bf16.msra.mxu1 %v4354_v40 }
 0x373   :  { %3677 = vmatprep.subr.bf16.mxu0 %v4356_v41  ;;  %3709 = vmatprep.subr.bf16.mxu1 %v4359_v45 }
 0x376   :  { %3679 = vmatpush1.bf16.msra.mxu0 %v4362_v52  ;;  %3711 = vmatpush1.bf16.msra.mxu1 %v4366_v53 }
 0x377   :  { %3681 = vmatprep.subr.bf16.mxu0 %v4368_v54  ;;  %3713 = vmatprep.subr.bf16.mxu1 %v4371_v58 }
 0x37a   :  { %3683 = vmatpush1.bf16.msra.mxu0 %v4374_v2  ;;  %3715 = vmatpush1.bf16.msra.mxu1 %v4378_v3 }
 0x37b   :  { %3685 = vmatprep.subr.bf16.mxu0 %v4380_v4  ;;  %3717 = vmatprep.subr.bf16.mxu1 %v4383_v11 }
 0x37e   :  { %3687 = vmatpush1.bf16.msra.mxu0 %v4386_v20  ;;  %3719 = vmatpush1.bf16.msra.mxu1 %v4390_v21 }
 0x37f   :  { %3689 = vmatprep.subr.bf16.mxu0 %v4392_v22  ;;  %3721 = vmatprep.subr.bf16.mxu1 %v4395_v29 }
 0x382   :  { %3691 = vmatpush1.bf16.msra.mxu0 %v4398_v37  ;;  %3723 = vmatpush1.bf16.msra.mxu1 %v4407_v39 }
 0x383   :  { %3693 = vmatprep.subr.bf16.mxu0 %v4409_v42  ;;  %3725 = vmatprep.subr.bf16.mxu1 %v4414_v47 }
 0x386   :  { %3695 = vmatpush1.bf16.msra.mxu0 %v4418_v57  ;;  %3727 = vmatpush1.bf16.msra.mxu1 %v4423_v60 }
 0x387   :  { %3729 = vmatprep.subr.bf16.mxu0 %v4425_v61  ;;  %3733 = vmatprep.subr.bf16.mxu1 %v4429_v6 }
 0x43c   :  { %v1546_v43 = vpop.f32.mrb[6].mxu0  ;;  %v1617_v44 = vpop.f32.mrb[6].mxu1 }
 0x43d   :  { %v1622_v49 = vadd.f32 %v1546_v43, %v4489_v33  ;;  %v1548_v46 = vpop.f32.mrb[7].mxu0  ;;  %v1619_v1 = vpop.f32.mrb[7].mxu1  ;;  %v1624_v24 = vadd.f32 %v1617_v44, %v4494_v48 }
 0x43e   :  { %v1623_v50 = vadd.f32 %v1548_v46, %v4491_v35  ;;  %v1625_v55 = vadd.f32 %v1619_v1, %v4498_v63  ;;  %v1650_v43 = vpop.permute.xlu1 %1649 }
 0x43f   :  { %v1626_v51 = vmul.f32 0.5, %v1622_v49  ;;  %vm1651_vm12 = vcmp.eq.s32.totalorder %v1650_v43, 1 }
 0x440   :  { %v1630_v16 = vmul.f32 0.5, %v1623_v50  ;;  %v1635_v56 = vmul.f32 0.5, %v1625_v55 }
 0x441   :  { %4029 = vtanh.f32 %v1626_v51 }
 0x442   :  { %4031 = vtanh.f32 %v1630_v16 }
 0x443   :  { %4033 = vtanh.f32 %v1624_v24 }
 0x444   :  { %4035 = vtanh.f32 %v1635_v56 }
 0x44b   :  { %v4030_v38 = vpop.eup %4029 }
 0x44c   :  { %v4032_v59 = vpop.eup %4031  ;;  %v1628_v62 = vmul.f32 0.5, %v4030_v38 }
 0x44d   :  { %v1632_v7 = vmul.f32 0.5, %v4032_v59  ;;  %v4034_v17 = vpop.eup %4033 }
 0x44e   :  { %v1629_v13 = vadd.f32 0.5, %v1628_v62  ;;  %v4036_v46 = vpop.eup %4035 }
 0x44f   :  { %v1633_v25 = vadd.f32 0.5, %v1632_v7  ;;  %v1637_v1 = vmul.f32 0.5, %v4036_v46 }
 0x450   :  { %v1640_v26 = vmul.f32 %v4034_v17, %v1629_v13 }
 0x451   :  { %v1639_v34 = vmul.f32 %v1633_v25, %v4637_v31  ;;  %v1638_v50 = vadd.f32 0.5, %v1637_v1  ;;  %v1722_v25 = vld [vmem:[#allocation2 + $0x20] sm:$0xff] }
 0x453   :  { %v1641_v49 = vadd.f32 %v1640_v26, %v1639_v34 }
 0x455   :  { %4037 = vtanh.f32 %v1641_v49  ;;  %v4698_v44 = vsel %vm1651_vm12, %v1641_v49, %v4637_v31 }
 0x45f   :  { %v4038_v51 = vpop.eup %4037 }
 0x460   :  { %v1643_v16 = vmul.f32 %v4038_v51, %v1638_v50 }
 0x462   :  { %v1654_v24 = vsel %vm1651_vm12, %v1643_v16, 0.0  ;;  %v4701_v55 = vsel %vm1651_vm12, %v1643_v16, %v4640_v30 }
 0x463   :  { %v1656_v56 = vcombine.high %v1654_v24, %v1654_v24  ;;  %v1663_v38 = vrot.slane %v1654_v24, %v4504_v8  ;;  %1788 = vmatmul.mubr.f32.vlgmr.msra.gmra.mrb[8].mxu0 %v4701_v55  ;;  %1859 = vmatmul.mubr.f32.vlgmr.msra.gmra.mrb[8].mxu1 %v4701_v55 }
 0x464   :  { %3731 = vmatpush1.bf16.msra.mxu0 %v4432_v12  ;;  %3735 = vmatpush1.bf16.msra.mxu1 %v4437_v15 }
 0x465   :  { %v1670_v31 = vrot.slane %v1656_v56, %v4504_v8  ;;  %v1671_v59 = vcombine.high %v1663_v38, %v1663_v38  ;;  %v1679_v62 = vrot.slane %v1663_v38, %v4504_v8  ;;  %3344 = vst.sshfl [vmem:[#allocation8 + $0x3] sm:$0x1 pattern:$0x73625140] %v1663_v38  ;;  %1932 = vmatprep.mubr.f32.mxu0 %v4228_v0 }
 0x466   :  { %2003 = vmatprep.mubr.f32.mxu1 %v4228_v0  ;;  %3737 = vmatprep.subr.bf16.mxu0 %v4323_v5 }
 0x467   :  { %3769 = vmatprep.subr.bf16.mxu1 %v4325_v9  ;;  %v1672_v30 = vcombine.high %v1670_v31, %v1670_v31  ;;  %v1686_v7 = vrot.slane %v1670_v31, %v4504_v8  ;;  %v1693_v13 = vrot.slane %v1671_v59, %v4504_v8  ;;  %v1701_v17 = vcombine.high %v1679_v62, %v1679_v62 }
 0x468   :  { %3345 = vst.sshfl [vmem:[#allocation8 + $0xb] sm:$0x1 pattern:$0x73625140] %v1671_v59 }
 0x469   :  { %3346 = vst.sshfl [vmem:[#allocation8 + $0x23] sm:$0x1 pattern:$0x73625140] %v1670_v31  ;;  %v1700_v26 = vrot.slane %v1672_v30, %v4504_v8  ;;  %v1702_v34 = vcombine.high %v1686_v7, %v1686_v7  ;;  %v1703_v43 = vcombine.high %v1693_v13, %v1693_v13  ;;  %1715 = vst [vmem:[#allocation8 + $0x13] sm:$0x1] %v1701_v17 }
 0x46a   :  { %3347 = vst.sshfl [vmem:[#allocation8 + $0x2b] sm:$0x1 pattern:$0x73625140] %v1672_v30 }
 0x46b   :  { %v1704_v49 = vcombine.high %v1700_v26, %v1700_v26  ;;  %1716 = vst [vmem:[#allocation8 + $0x1b] sm:$0x1] %v1703_v43  ;;  %1719 = vst [vmem:[#allocation8 + $0x33] sm:$0x1] %v1702_v34  ;;  %3348 = vmatmul.mubr.msk.f32.vlgmr.msra.gmra.mrb[8].mxu0 %vm292_vm4, %v1722_v25  ;;  %3349 = vmatmul.mubr.msk.f32.vlgmr.msra.gmra.mrb[8].mxu1 %vm292_vm4, %v1722_v25 }
 0x46c   :  { %3739 = vmatpush1.bf16.msra.mxu0 %v4327_v10  ;;  %3771 = vmatpush1.bf16.msra.mxu1 %v4330_v14 }
 0x46d   :  { %1720 = vst [vmem:[#allocation8 + $0x3b] sm:$0x1] %v1704_v49  ;;  %3741 = vmatprep.subr.bf16.mxu0 %v4334_v18  ;;  %3773 = vmatprep.subr.bf16.mxu1 %v4336_v19 }
 0x46e   :  { %2175 = vmatprep.mubr.f32.mxu0 %v4228_v0  ;;  %2246 = vmatprep.mubr.f32.mxu1 %v4228_v0 }
 0x470   :  { %3743 = vmatpush1.bf16.msra.mxu0 %v4339_v23  ;;  %3775 = vmatpush1.bf16.msra.mxu1 %v4343_v27 }
 0x471   :  { %3745 = vmatprep.subr.bf16.mxu0 %v4345_v28  ;;  %3777 = vmatprep.subr.bf16.mxu1 %v4347_v32 }
 0x474   :  { %3747 = vmatpush1.bf16.msra.mxu0 %v4350_v36  ;;  %3779 = vmatpush1.bf16.msra.mxu1 %v4354_v40 }
 0x475   :  { %3749 = vmatprep.subr.bf16.mxu0 %v4356_v41  ;;  %3781 = vmatprep.subr.bf16.mxu1 %v4359_v45 }
 0x478   :  { %3751 = vmatpush1.bf16.msra.mxu0 %v4362_v52  ;;  %3783 = vmatpush1.bf16.msra.mxu1 %v4366_v53 }
 0x479   :  { %3753 = vmatprep.subr.bf16.mxu0 %v4368_v54  ;;  %3785 = vmatprep.subr.bf16.mxu1 %v4371_v58 }
 0x47c   :  { %3755 = vmatpush1.bf16.msra.mxu0 %v4374_v2  ;;  %3787 = vmatpush1.bf16.msra.mxu1 %v4378_v3 }
 0x47d   :  { %3757 = vmatprep.subr.bf16.mxu0 %v4380_v4  ;;  %3789 = vmatprep.subr.bf16.mxu1 %v4383_v11 }
 0x480   :  { %3759 = vmatpush1.bf16.msra.mxu0 %v4386_v20  ;;  %3791 = vmatpush1.bf16.msra.mxu1 %v4390_v21 }
 0x481   :  { %3761 = vmatprep.subr.bf16.mxu0 %v4392_v22  ;;  %3793 = vmatprep.subr.bf16.mxu1 %v4395_v29 }
 0x484   :  { %3763 = vmatpush1.bf16.msra.mxu0 %v4398_v37  ;;  %3795 = vmatpush1.bf16.msra.mxu1 %v4407_v39 }
 0x485   :  { %3765 = vmatprep.subr.bf16.mxu0 %v4409_v42  ;;  %3797 = vmatprep.subr.bf16.mxu1 %v4414_v47 }
 0x488   :  { %3767 = vmatpush1.bf16.msra.mxu0 %v4418_v57  ;;  %3799 = vmatpush1.bf16.msra.mxu1 %v4423_v60 }
 0x489   :  { %3801 = vmatprep.subr.bf16.mxu0 %v4425_v61  ;;  %3805 = vmatprep.subr.bf16.mxu1 %v4429_v6 }
 0x53e   :  { %v1934_v46 = vpop.f32.mrb[8].mxu0  ;;  %v2005_v1 = vpop.f32.mrb[8].mxu1 }
 0x53f   :  { %v2010_v50 = vadd.f32 %v1934_v46, %v4489_v33  ;;  %v1936_v51 = vpop.f32.mrb[9].mxu0  ;;  %v2007_v16 = vpop.f32.mrb[9].mxu1  ;;  %v2012_v31 = vadd.f32 %v2005_v1, %v4494_v48 }
 0x540   :  { %v2011_v24 = vadd.f32 %v1936_v51, %v4491_v35  ;;  %v2013_v59 = vadd.f32 %v2007_v16, %v4498_v63  ;;  %v2038_v46 = vpop.permute.xlu0 %2037 }
 0x541   :  { %v2014_v56 = vmul.f32 0.5, %v2010_v50  ;;  %vm2039_vm13 = vcmp.eq.s32.totalorder %v2038_v46, 1 }
 0x542   :  { %v2018_v38 = vmul.f32 0.5, %v2011_v24  ;;  %v2023_v62 = vmul.f32 0.5, %v2013_v59 }
 0x543   :  { %4039 = vtanh.f32 %v2014_v56 }
 0x544   :  { %4041 = vtanh.f32 %v2018_v38 }
 0x545   :  { %4043 = vtanh.f32 %v2012_v31 }
 0x546   :  { %4045 = vtanh.f32 %v2023_v62 }
 0x54d   :  { %v4040_v30 = vpop.eup %4039 }
 0x54e   :  { %v4042_v7 = vpop.eup %4041  ;;  %v2016_v13 = vmul.f32 0.5, %v4040_v30 }
 0x54f   :  { %v2020_v17 = vmul.f32 0.5, %v4042_v7  ;;  %v4044_v26 = vpop.eup %4043 }
 0x550   :  { %v2017_v25 = vadd.f32 0.5, %v2016_v13  ;;  %v4046_v51 = vpop.eup %4045 }
 0x551   :  { %v2021_v34 = vadd.f32 0.5, %v2020_v17  ;;  %v2025_v16 = vmul.f32 0.5, %v4046_v51 }
 0x552   :  { %v2028_v43 = vmul.f32 %v4044_v26, %v2017_v25 }
 0x553   :  { %v2027_v49 = vmul.f32 %v2021_v34, %v4698_v44  ;;  %v2026_v24 = vadd.f32 0.5, %v2025_v16  ;;  %v2110_v34 = vld [vmem:[#allocation2 + $0x28] sm:$0xff] }
 0x555   :  { %v2029_v50 = vadd.f32 %v2028_v43, %v2027_v49 }
 0x557   :  { %4047 = vtanh.f32 %v2029_v50  ;;  %v4759_v1 = vsel %vm2039_vm13, %v2029_v50, %v4698_v44 }
 0x561   :  { %v4048_v56 = vpop.eup %4047 }
 0x562   :  { %v2031_v38 = vmul.f32 %v4048_v56, %v2026_v24 }
 0x564   :  { %v2042_v31 = vsel %vm2039_vm13, %v2031_v38, 0.0  ;;  %v4762_v59 = vsel %vm2039_vm13, %v2031_v38, %v4701_v55 }
 0x565   :  { %v2044_v62 = vcombine.high %v2042_v31, %v2042_v31  ;;  %v2051_v30 = vrot.slane %v2042_v31, %v4504_v8  ;;  %2176 = vmatmul.mubr.f32.vlgmr.msra.gmra.mrb[10].mxu0 %v4762_v59  ;;  %2247 = vmatmul.mubr.f32.vlgmr.msra.gmra.mrb[10].mxu1 %v4762_v59 }
 0x566   :  { %3803 = vmatpush1.bf16.msra.mxu0 %v4432_v12  ;;  %3807 = vmatpush1.bf16.msra.mxu1 %v4437_v15 }
 0x567   :  { %v2058_v44 = vrot.slane %v2044_v62, %v4504_v8  ;;  %v2059_v7 = vcombine.high %v2051_v30, %v2051_v30  ;;  %v2067_v13 = vrot.slane %v2051_v30, %v4504_v8  ;;  %3351 = vst.sshfl [vmem:[#allocation8 + $0x4] sm:$0x1 pattern:$0x73625140] %v2051_v30  ;;  %2320 = vmatprep.mubr.f32.mxu0 %v4228_v0 }
 0x568   :  { %2391 = vmatprep.mubr.f32.mxu1 %v4228_v0  ;;  %3809 = vmatprep.subr.bf16.mxu0 %v4323_v5 }
 0x569   :  { %3841 = vmatprep.subr.bf16.mxu1 %v4325_v9  ;;  %v2060_v55 = vcombine.high %v2058_v44, %v2058_v44  ;;  %v2074_v17 = vrot.slane %v2058_v44, %v4504_v8  ;;  %v2081_v25 = vrot.slane %v2059_v7, %v4504_v8  ;;  %v2089_v26 = vcombine.high %v2067_v13, %v2067_v13 }
 0x56a   :  { %3352 = vst.sshfl [vmem:[#allocation8 + $0xc] sm:$0x1 pattern:$0x73625140] %v2059_v7 }
 0x56b   :  { %3353 = vst.sshfl [vmem:[#allocation8 + $0x24] sm:$0x1 pattern:$0x73625140] %v2058_v44  ;;  %v2088_v43 = vrot.slane %v2060_v55, %v4504_v8  ;;  %v2090_v49 = vcombine.high %v2074_v17, %v2074_v17  ;;  %v2091_v46 = vcombine.high %v2081_v25, %v2081_v25  ;;  %2103 = vst [vmem:[#allocation8 + $0x14] sm:$0x1] %v2089_v26 }
 0x56c   :  { %3354 = vst.sshfl [vmem:[#allocation8 + $0x2c] sm:$0x1 pattern:$0x73625140] %v2060_v55 }
 0x56d   :  { %v2092_v50 = vcombine.high %v2088_v43, %v2088_v43  ;;  %2104 = vst [vmem:[#allocation8 + $0x1c] sm:$0x1] %v2091_v46  ;;  %2107 = vst [vmem:[#allocation8 + $0x34] sm:$0x1] %v2090_v49  ;;  %3355 = vmatmul.mubr.msk.f32.vlgmr.msra.gmra.mrb[10].mxu0 %vm292_vm4, %v2110_v34  ;;  %3356 = vmatmul.mubr.msk.f32.vlgmr.msra.gmra.mrb[10].mxu1 %vm292_vm4, %v2110_v34 }
 0x56e   :  { %3811 = vmatpush1.bf16.msra.mxu0 %v4327_v10  ;;  %3843 = vmatpush1.bf16.msra.mxu1 %v4330_v14 }
 0x56f   :  { %2108 = vst [vmem:[#allocation8 + $0x3c] sm:$0x1] %v2092_v50  ;;  %3813 = vmatprep.subr.bf16.mxu0 %v4334_v18  ;;  %3845 = vmatprep.subr.bf16.mxu1 %v4336_v19 }
 0x570   :  { %2563 = vmatprep.mubr.f32.mxu0 %v4228_v0  ;;  %2634 = vmatprep.mubr.f32.mxu1 %v4228_v0 }
 0x572   :  { %3815 = vmatpush1.bf16.msra.mxu0 %v4339_v23  ;;  %3847 = vmatpush1.bf16.msra.mxu1 %v4343_v27 }
 0x573   :  { %3817 = vmatprep.subr.bf16.mxu0 %v4345_v28  ;;  %3849 = vmatprep.subr.bf16.mxu1 %v4347_v32 }
 0x576   :  { %3819 = vmatpush1.bf16.msra.mxu0 %v4350_v36  ;;  %3851 = vmatpush1.bf16.msra.mxu1 %v4354_v40 }
 0x577   :  { %3821 = vmatprep.subr.bf16.mxu0 %v4356_v41  ;;  %3853 = vmatprep.subr.bf16.mxu1 %v4359_v45 }
 0x57a   :  { %3823 = vmatpush1.bf16.msra.mxu0 %v4362_v52  ;;  %3855 = vmatpush1.bf16.msra.mxu1 %v4366_v53 }
 0x57b   :  { %3825 = vmatprep.subr.bf16.mxu0 %v4368_v54  ;;  %3857 = vmatprep.subr.bf16.mxu1 %v4371_v58 }
 0x57e   :  { %3827 = vmatpush1.bf16.msra.mxu0 %v4374_v2  ;;  %3859 = vmatpush1.bf16.msra.mxu1 %v4378_v3 }
 0x57f   :  { %3829 = vmatprep.subr.bf16.mxu0 %v4380_v4  ;;  %3861 = vmatprep.subr.bf16.mxu1 %v4383_v11 }
 0x582   :  { %3831 = vmatpush1.bf16.msra.mxu0 %v4386_v20  ;;  %3863 = vmatpush1.bf16.msra.mxu1 %v4390_v21 }
 0x583   :  { %3833 = vmatprep.subr.bf16.mxu0 %v4392_v22  ;;  %3865 = vmatprep.subr.bf16.mxu1 %v4395_v29 }
 0x586   :  { %3835 = vmatpush1.bf16.msra.mxu0 %v4398_v37  ;;  %3867 = vmatpush1.bf16.msra.mxu1 %v4407_v39 }
 0x587   :  { %3837 = vmatprep.subr.bf16.mxu0 %v4409_v42  ;;  %3869 = vmatprep.subr.bf16.mxu1 %v4414_v47 }
 0x58a   :  { %3839 = vmatpush1.bf16.msra.mxu0 %v4418_v57  ;;  %3871 = vmatpush1.bf16.msra.mxu1 %v4423_v60 }
 0x58b   :  { %3873 = vmatprep.subr.bf16.mxu0 %v4425_v61  ;;  %3877 = vmatprep.subr.bf16.mxu1 %v4429_v6 }
 0x640   :  { %v2322_v51 = vpop.f32.mrb[10].mxu0  ;;  %v2393_v16 = vpop.f32.mrb[10].mxu1 }
 0x641   :  { %v2398_v24 = vadd.f32 %v2322_v51, %v4489_v33  ;;  %v2324_v56 = vpop.f32.mrb[11].mxu0  ;;  %v2395_v38 = vpop.f32.mrb[11].mxu1  ;;  %v2400_v44 = vadd.f32 %v2393_v16, %v4494_v48 }
 0x642   :  { %v2399_v31 = vadd.f32 %v2324_v56, %v4491_v35  ;;  %v2401_v7 = vadd.f32 %v2395_v38, %v4498_v63  ;;  %v2426_v51 = vpop.permute.xlu1 %2425 }
 0x643   :  { %v2402_v62 = vmul.f32 0.5, %v2398_v24  ;;  %vm2427_vm14 = vcmp.eq.s32.totalorder %v2426_v51, 1 }
 0x644   :  { %v2406_v30 = vmul.f32 0.5, %v2399_v31  ;;  %v2411_v13 = vmul.f32 0.5, %v2401_v7 }
 0x645   :  { %4049 = vtanh.f32 %v2402_v62 }
 0x646   :  { %4051 = vtanh.f32 %v2406_v30 }
 0x647   :  { %4053 = vtanh.f32 %v2400_v44 }
 0x648   :  { %4055 = vtanh.f32 %v2411_v13 }
 0x64f   :  { %v4050_v55 = vpop.eup %4049 }
 0x650   :  { %v4052_v17 = vpop.eup %4051  ;;  %v2404_v25 = vmul.f32 0.5, %v4050_v55 }
 0x651   :  { %v2408_v26 = vmul.f32 0.5, %v4052_v17  ;;  %v4054_v43 = vpop.eup %4053 }
 0x652   :  { %v2405_v34 = vadd.f32 0.5, %v2404_v25  ;;  %v4056_v56 = vpop.eup %4055 }
 0x653   :  { %v2409_v49 = vadd.f32 0.5, %v2408_v26  ;;  %v2413_v38 = vmul.f32 0.5, %v4056_v56 }
 0x654   :  { %v2416_v46 = vmul.f32 %v4054_v43, %v2405_v34 }
 0x655   :  { %v2415_v50 = vmul.f32 %v2409_v49, %v4759_v1  ;;  %v2414_v31 = vadd.f32 0.5, %v2413_v38  ;;  %v2498_v49 = vld [vmem:[#allocation2 + $0x30] sm:$0xff] }
 0x657   :  { %v2417_v24 = vadd.f32 %v2416_v46, %v2415_v50 }
 0x659   :  { %4057 = vtanh.f32 %v2417_v24  ;;  %v4820_v16 = vsel %vm2427_vm14, %v2417_v24, %v4759_v1 }
 0x663   :  { %v4058_v62 = vpop.eup %4057 }
 0x664   :  { %v2419_v30 = vmul.f32 %v4058_v62, %v2414_v31 }
 0x666   :  { %v2430_v44 = vsel %vm2427_vm14, %v2419_v30, 0.0  ;;  %v4823_v7 = vsel %vm2427_vm14, %v2419_v30, %v4762_v59 }
 0x667   :  { %v2432_v13 = vcombine.high %v2430_v44, %v2430_v44  ;;  %v2439_v55 = vrot.slane %v2430_v44, %v4504_v8  ;;  %2564 = vmatmul.mubr.f32.vlgmr.msra.gmra.mrb[12].mxu0 %v4823_v7  ;;  %2635 = vmatmul.mubr.f32.vlgmr.msra.gmra.mrb[12].mxu1 %v4823_v7 }
 0x668   :  { %3875 = vmatpush1.bf16.msra.mxu0 %v4432_v12  ;;  %3879 = vmatpush1.bf16.msra.mxu1 %v4437_v15 }
 0x669   :  { %v2446_v1 = vrot.slane %v2432_v13, %v4504_v8  ;;  %v2447_v17 = vcombine.high %v2439_v55, %v2439_v55  ;;  %v2455_v25 = vrot.slane %v2439_v55, %v4504_v8  ;;  %3358 = vst.sshfl [vmem:[#allocation8 + $0x5] sm:$0x1 pattern:$0x73625140] %v2439_v55  ;;  %2708 = vmatprep.mubr.f32.mxu0 %v4228_v0 }
 0x66a   :  { %2779 = vmatprep.mubr.f32.mxu1 %v4228_v0  ;;  %3881 = vmatprep.subr.bf16.mxu0 %v4323_v5 }
 0x66b   :  { %3913 = vmatprep.subr.bf16.mxu1 %v4325_v9  ;;  %v2448_v59 = vcombine.high %v2446_v1, %v2446_v1  ;;  %v2462_v26 = vrot.slane %v2446_v1, %v4504_v8  ;;  %v2469_v34 = vrot.slane %v2447_v17, %v4504_v8  ;;  %v2477_v43 = vcombine.high %v2455_v25, %v2455_v25 }
 0x66c   :  { %3359 = vst.sshfl [vmem:[#allocation8 + $0xd] sm:$0x1 pattern:$0x73625140] %v2447_v17 }
 0x66d   :  { %3360 = vst.sshfl [vmem:[#allocation8 + $0x25] sm:$0x1 pattern:$0x73625140] %v2446_v1  ;;  %v2476_v46 = vrot.slane %v2448_v59, %v4504_v8  ;;  %v2478_v50 = vcombine.high %v2462_v26, %v2462_v26  ;;  %v2479_v51 = vcombine.high %v2469_v34, %v2469_v34  ;;  %2491 = vst [vmem:[#allocation8 + $0x15] sm:$0x1] %v2477_v43 }
 0x66e   :  { %3361 = vst.sshfl [vmem:[#allocation8 + $0x2d] sm:$0x1 pattern:$0x73625140] %v2448_v59 }
 0x66f   :  { %v2480_v24 = vcombine.high %v2476_v46, %v2476_v46  ;;  %2492 = vst [vmem:[#allocation8 + $0x1d] sm:$0x1] %v2479_v51  ;;  %2495 = vst [vmem:[#allocation8 + $0x35] sm:$0x1] %v2478_v50  ;;  %3362 = vmatmul.mubr.msk.f32.vlgmr.msra.gmra.mrb[12].mxu0 %vm292_vm4, %v2498_v49  ;;  %3363 = vmatmul.mubr.msk.f32.vlgmr.msra.gmra.mrb[12].mxu1 %vm292_vm4, %v2498_v49 }
 0x670   :  { %3883 = vmatpush1.bf16.msra.mxu0 %v4327_v10  ;;  %3915 = vmatpush1.bf16.msra.mxu1 %v4330_v14 }
 0x671   :  { %2496 = vst [vmem:[#allocation8 + $0x3d] sm:$0x1] %v2480_v24  ;;  %3885 = vmatprep.subr.bf16.mxu0 %v4334_v18  ;;  %3917 = vmatprep.subr.bf16.mxu1 %v4336_v19 }
 0x672   :  { %2951 = vmatprep.mubr.f32.mxu0 %v4228_v0  ;;  %3022 = vmatprep.mubr.f32.mxu1 %v4228_v0 }
 0x674   :  { %3887 = vmatpush1.bf16.msra.mxu0 %v4339_v23  ;;  %3919 = vmatpush1.bf16.msra.mxu1 %v4343_v27 }
 0x675   :  { %3889 = vmatprep.subr.bf16.mxu0 %v4345_v28  ;;  %3921 = vmatprep.subr.bf16.mxu1 %v4347_v32 }
 0x678   :  { %3891 = vmatpush1.bf16.msra.mxu0 %v4350_v36  ;;  %3923 = vmatpush1.bf16.msra.mxu1 %v4354_v40 }
 0x679   :  { %3893 = vmatprep.subr.bf16.mxu0 %v4356_v41  ;;  %3925 = vmatprep.subr.bf16.mxu1 %v4359_v45 }
 0x67c   :  { %3895 = vmatpush1.bf16.msra.mxu0 %v4362_v52  ;;  %3927 = vmatpush1.bf16.msra.mxu1 %v4366_v53 }
 0x67d   :  { %3897 = vmatprep.subr.bf16.mxu0 %v4368_v54  ;;  %3929 = vmatprep.subr.bf16.mxu1 %v4371_v58 }
 0x680   :  { %3899 = vmatpush1.bf16.msra.mxu0 %v4374_v2  ;;  %3931 = vmatpush1.bf16.msra.mxu1 %v4378_v3  ;;  %v2814_v3 = vpop.permute.xlu0 %2813 }
 0x681   :  { %3901 = vmatprep.subr.bf16.mxu0 %v4380_v4  ;;  %3933 = vmatprep.subr.bf16.mxu1 %v4383_v11  ;;  %vm2815_vm15 = vcmp.eq.s32.totalorder %v2814_v3, 1 }
 0x684   :  { %3903 = vmatpush1.bf16.msra.mxu0 %v4386_v20  ;;  %3935 = vmatpush1.bf16.msra.mxu1 %v4390_v21 }
 0x685   :  { %3905 = vmatprep.subr.bf16.mxu0 %v4392_v22  ;;  %3937 = vmatprep.subr.bf16.mxu1 %v4395_v29 }
 0x688   :  { %3907 = vmatpush1.bf16.msra.mxu0 %v4398_v37  ;;  %3939 = vmatpush1.bf16.msra.mxu1 %v4407_v39 }
 0x689   :  { %3909 = vmatprep.subr.bf16.mxu0 %v4409_v42  ;;  %3941 = vmatprep.subr.bf16.mxu1 %v4414_v47 }
 0x68c   :  { %3911 = vmatpush1.bf16.msra.mxu0 %v4418_v57  ;;  %3943 = vmatpush1.bf16.msra.mxu1 %v4423_v60 }
 0x68d   :  { %3945 = vmatprep.subr.bf16.mxu0 %v4425_v61  ;;  %3949 = vmatprep.subr.bf16.mxu1 %v4429_v6 }
 0x742   :  { %v2710_v5 = vpop.f32.mrb[12].mxu0  ;;  %v2781_v9 = vpop.f32.mrb[12].mxu1 }
 0x743   :  { %v2786_v10 = vadd.f32 %v2710_v5, %v4489_v33  ;;  %v2712_v14 = vpop.f32.mrb[13].mxu0  ;;  %v2783_v18 = vpop.f32.mrb[13].mxu1  ;;  %v2788_v28 = vadd.f32 %v2781_v9, %v4494_v48 }
 0x744   :  { %v2787_v19 = vadd.f32 %v2712_v14, %v4491_v35  ;;  %v2789_v32 = vadd.f32 %v2783_v18, %v4498_v63 }
 0x745   :  { %v2790_v23 = vmul.f32 0.5, %v2786_v10 }
 0x746   :  { %v2794_v27 = vmul.f32 0.5, %v2787_v19  ;;  %v2799_v36 = vmul.f32 0.5, %v2789_v32 }
 0x747   :  { %4059 = vtanh.f32 %v2790_v23 }
 0x748   :  { %4061 = vtanh.f32 %v2794_v27 }
 0x749   :  { %4063 = vtanh.f32 %v2788_v28 }
 0x74a   :  { %4065 = vtanh.f32 %v2799_v36 }
 0x751   :  { %v4060_v40 = vpop.eup %4059 }
 0x752   :  { %v4062_v41 = vpop.eup %4061  ;;  %v2792_v45 = vmul.f32 0.5, %v4060_v40 }
 0x753   :  { %v2796_v52 = vmul.f32 0.5, %v4062_v41  ;;  %v4064_v54 = vpop.eup %4063 }
 0x754   :  { %v2793_v53 = vadd.f32 0.5, %v2792_v45  ;;  %v4066_v21 = vpop.eup %4065 }
 0x755   :  { %v2797_v58 = vadd.f32 0.5, %v2796_v52  ;;  %v2801_v22 = vmul.f32 0.5, %v4066_v21 }
 0x756   :  { %v2804_v2 = vmul.f32 %v4064_v54, %v2793_v53 }
 0x757   :  { %v2803_v4 = vmul.f32 %v2797_v58, %v4820_v16  ;;  %v2802_v29 = vadd.f32 0.5, %v2801_v22 }
 0x759   :  { %v2805_v11 = vadd.f32 %v2804_v2, %v2803_v4 }
 0x75b   :  { %4067 = vtanh.f32 %v2805_v11  ;;  %v4881_v20 = vsel %vm2815_vm15, %v2805_v11, %v4820_v16 }
 0x765   :  { %v4068_v37 = vpop.eup %4067 }
 0x766   :  { %v2807_v39 = vmul.f32 %v4068_v37, %v2802_v29 }
 0x768   :  { %v2818_v42 = vsel %vm2815_vm15, %v2807_v39, 0.0  ;;  %v4884_v47 = vsel %vm2815_vm15, %v2807_v39, %v4823_v7 }
 0x769   :  { %v2820_v57 = vcombine.high %v2818_v42, %v2818_v42  ;;  %v2827_v60 = vrot.slane %v2818_v42, %v4504_v8  ;;  %2952 = vmatmul.mubr.f32.vlgmr.msra.gmra.mrb[14].mxu0 %v4884_v47  ;;  %3023 = vmatmul.mubr.f32.vlgmr.msra.gmra.mrb[14].mxu1 %v4884_v47 }
 0x76a   :  { %3947 = vmatpush1.bf16.msra.mxu0 %v4432_v12  ;;  %3951 = vmatpush1.bf16.msra.mxu1 %v4437_v15  ;;  %v2886_v12 = vld [vmem:[#allocation2 + $0x38] sm:$0xff] }
 0x76b   :  { %v2834_v61 = vrot.slane %v2820_v57, %v4504_v8  ;;  %v2835_v6 = vcombine.high %v2827_v60, %v2827_v60  ;;  %v2843_v16 = vrot.slane %v2827_v60, %v4504_v8  ;;  %3365 = vst.sshfl [vmem:[#allocation8 + $0x6] sm:$0x1 pattern:$0x73625140] %v2827_v60  ;;  %3096 = vmatprep.mubr.f32.mxu0 %v4228_v0 }
 0x76c   :  { %3167 = vmatprep.mubr.f32.mxu1 %v4228_v0 }
 0x76d   :  { %v2836_v56 = vcombine.high %v2834_v61, %v2834_v61  ;;  %v2850_v38 = vrot.slane %v2834_v61, %v4504_v8  ;;  %v2857_v31 = vrot.slane %v2835_v6, %v4504_v8  ;;  %v2865_v62 = vcombine.high %v2843_v16, %v2843_v16  ;;  %3366 = vst.sshfl [vmem:[#allocation8 + $0xe] sm:$0x1 pattern:$0x73625140] %v2835_v6 }
 0x76e   :  { %3367 = vst.sshfl [vmem:[#allocation8 + $0x26] sm:$0x1 pattern:$0x73625140] %v2834_v61 }
 0x76f   :  { %v2864_v15 = vrot.slane %v2836_v56, %v4504_v8  ;;  %v2866_v30 = vcombine.high %v2850_v38, %v2850_v38  ;;  %v2867_v44 = vcombine.high %v2857_v31, %v2857_v31  ;;  %2879 = vst [vmem:[#allocation8 + $0x16] sm:$0x1] %v2865_v62  ;;  %3368 = vst.sshfl [vmem:[#allocation8 + $0x2e] sm:$0x1 pattern:$0x73625140] %v2836_v56 }
 0x771   :  { %v2868_v7 = vcombine.high %v2864_v15, %v2864_v15  ;;  %2880 = vst [vmem:[#allocation8 + $0x1e] sm:$0x1] %v2867_v44  ;;  %2883 = vst [vmem:[#allocation8 + $0x36] sm:$0x1] %v2866_v30  ;;  %3369 = vmatmul.mubr.msk.f32.vlgmr.msra.gmra.mrb[14].mxu0 %vm292_vm4, %v2886_v12  ;;  %3370 = vmatmul.mubr.msk.f32.vlgmr.msra.gmra.mrb[14].mxu1 %vm292_vm4, %v2886_v12 }
 0x773   :  { %2884 = vst [vmem:[#allocation8 + $0x3e] sm:$0x1] %v2868_v7 }
 0x844   :  { %v3098_v0 = vpop.f32.mrb[14].mxu0  ;;  %v3169_v13 = vpop.f32.mrb[14].mxu1 }
 0x845   :  { %v3174_v55 = vadd.f32 %v3098_v0, %v4489_v33  ;;  %v3100_v1 = vpop.f32.mrb[15].mxu0  ;;  %v3171_v17 = vpop.f32.mrb[15].mxu1  ;;  %v3176_v34 = vadd.f32 %v3169_v13, %v4494_v48 }
 0x846   :  { %v3175_v25 = vadd.f32 %v3100_v1, %v4491_v35  ;;  %v3177_v43 = vadd.f32 %v3171_v17, %v4498_v63  ;;  %v3202_v35 = vpop.permute.xlu1 %3201 }
 0x847   :  { %v3178_v59 = vmul.f32 0.5, %v3174_v55  ;;  %vm3203_vm0 = vcmp.eq.s32.totalorder %v3202_v35, 1 }
 0x848   :  { %v3182_v26 = vmul.f32 0.5, %v3175_v25  ;;  %v3187_v49 = vmul.f32 0.5, %v3177_v43 }
 0x849   :  { %4069 = vtanh.f32 %v3178_v59 }
 0x84a   :  { %4071 = vtanh.f32 %v3182_v26 }
 0x84b   :  { %4073 = vtanh.f32 %v3176_v34 }
 0x84c   :  { %4075 = vtanh.f32 %v3187_v49 }
 0x853   :  { %v4070_v46 = vpop.eup %4069 }
 0x854   :  { %v4072_v50 = vpop.eup %4071  ;;  %v3180_v51 = vmul.f32 0.5, %v4070_v46 }
 0x855   :  { %v3184_v24 = vmul.f32 0.5, %v4072_v50  ;;  %v4074_v5 = vpop.eup %4073 }
 0x856   :  { %v3181_v33 = vadd.f32 0.5, %v3180_v51  ;;  %v4076_v63 = vpop.eup %4075 }
 0x857   :  { %v3185_v9 = vadd.f32 0.5, %v3184_v24  ;;  %v3189_v19 = vmul.f32 0.5, %v4076_v63 }
 0x858   :  { %v3192_v10 = vmul.f32 %v4074_v5, %v3181_v33 }
 0x859   :  { %v3191_v14 = vmul.f32 %v3185_v9, %v4881_v20  ;;  %v3190_v23 = vadd.f32 0.5, %v3189_v19 }
 0x85b   :  { %v3193_v18 = vadd.f32 %v3192_v10, %v3191_v14 }
 0x85d   :  { %4077 = vtanh.f32 %v3193_v18  ;;  %v3205_v48 = vsel %vm3203_vm0, %v3193_v18, %v4881_v20 }
 0x85e   :  { %3274 = vst [vmem:[#allocation11] sm:$0xff] %v3205_v48 }
 0x867   :  { %v4078_v27 = vpop.eup %4077 }
 0x868   :  { %v3195_v28 = vmul.f32 %v4078_v27, %v3190_v23 }
 0x86a   :  { %v3206_v32 = vsel %vm3203_vm0, %v3195_v28, 0.0  ;;  %v3204_v36 = vsel %vm3203_vm0, %v3195_v28, %v4884_v47 }
 0x86b   :  { %v3208_v40 = vcombine.high %v3206_v32, %v3206_v32  ;;  %v3215_v41 = vrot.slane %v3206_v32, %v4504_v8  ;;  %3273 = vst [vmem:[#allocation9] sm:$0xff] %v3204_v36 }
 0x86c   :  { %4158 = shalt.err (!%p4155_p0)
}
 0x86d   :  { %s4159_s24 = scalar_lea.hbm %s4965_s6, 128 }
 0x86e   :  { %p4160_p1 = scmp.ne.s32.totalorder %s4965_s6, %s4159_s24  ;;  %p4163_p2 = scmp.lt.u32.totalorder %s4159_s24, %s4965_s6 }
 0x870   :  { %p4165_p3 = pnand %p4163_p2, %p4160_p1 }
 0x872   :  { %4168 = shalt.err (!%p4165_p3)
}
 0x873   :  { %3296 = dma.vmem_to_hbm [thread:$0]  %s3294_s18, 128, %s4965_s6, [#allocation10]   ;;  %v3222_v45 = vrot.slane %v3208_v40, %v4504_v8  ;;  %v3223_v52 = vcombine.high %v3215_v41, %v3215_v41  ;;  %v3231_v53 = vrot.slane %v3215_v41, %v4504_v8  ;;  %3372 = vst.sshfl [vmem:[#allocation8 + $0x7] sm:$0x1 pattern:$0x73625140] %v3215_v41 }
 0x874   :  { %s4169_s9 = scalar_lea.vmem %s4907_s20, 128  ;;  %p4174_p5 = scmp.lt.s32.totalorder %s4907_s20, %s4907_s20 }
 0x875   :  { %p4170_p4 = scmp.ne.s32.totalorder %s4907_s20, %s4169_s9  ;;  %p4175_p6 = scmp.lt.s32.totalorder %s4169_s9, %s4169_s9 }
 0x877   :  { %p4176_p7 = por %p4175_p6, %p4174_p5 }
 0x879   :  { %p4177_p8 = pnand %p4176_p7, %p4170_p4 }
 0x87b   :  { %4180 = shalt.err (!%p4177_p8)
}
 0x87c   :  { %s4181_s14 = scalar_lea.hbm %s4966_s7, 128 }
 0x87d   :  { %p4182_p9 = scmp.ne.s32.totalorder %s4966_s7, %s4181_s14  ;;  %p4185_p10 = scmp.lt.u32.totalorder %s4181_s14, %s4966_s7 }
 0x87f   :  { %p4187_p11 = pnand %p4185_p10, %p4182_p9 }
 0x881   :  { %4190 = shalt.err (!%p4187_p11)
}
 0x882   :  { %3306 = dma.vmem_to_hbm [thread:$0]  %s4907_s20, 128, %s4966_s7, [#allocation10]   ;;  %v3224_v54 = vcombine.high %v3222_v45, %v3222_v45  ;;  %v3238_v58 = vrot.slane %v3222_v45, %v4504_v8  ;;  %v3245_v2 = vrot.slane %v3223_v52, %v4504_v8  ;;  %v3253_v3 = vcombine.high %v3231_v53, %v3231_v53  ;;  %3373 = vst.sshfl [vmem:[#allocation8 + $0xf] sm:$0x1 pattern:$0x73625140] %v3223_v52 }
 0x883   :  { %3374 = vst.sshfl [vmem:[#allocation8 + $0x27] sm:$0x1 pattern:$0x73625140] %v3222_v45  ;;  %s4233_s11 = smov [#allocation8]  }
 0x884   :  { %s3280_s0 = sshll.u32 %s4233_s11, 4  ;;  %v3252_v4 = vrot.slane %v3224_v54, %v4504_v8  ;;  %v3254_v11 = vcombine.high %v3238_v58, %v3238_v58  ;;  %v3255_v20 = vcombine.high %v3245_v2, %v3245_v2  ;;  %3267 = vst [vmem:[#allocation8 + $0x17] sm:$0x1] %v3253_v3  ;;  %s3281_s0 = int_to_ptr.vmem [resolvable:$true] %s3280_s0 }
 0x885   :  { %3375 = vst.sshfl [vmem:[#allocation8 + $0x2f] sm:$0x1 pattern:$0x73625140] %v3224_v54  ;;  %s4191_s7 = scalar_lea.vmem %s3281_s0, 1024  ;;  %p4196_p13 = scmp.lt.s32.totalorder %s3281_s0, %s3281_s0 }
 0x886   :  { %v3256_v21 = vcombine.high %v3252_v4, %v3252_v4  ;;  %3268 = vst [vmem:[#allocation8 + $0x1f] sm:$0x1] %v3255_v20  ;;  %3271 = vst [vmem:[#allocation8 + $0x37] sm:$0x1] %v3254_v11  ;;  %p4192_p12 = scmp.ne.s32.totalorder %s3281_s0, %s4191_s7  ;;  %p4197_p0 = scmp.lt.s32.totalorder %s4191_s7, %s4191_s7 }
 0x888   :  { %3272 = vst [vmem:[#allocation8 + $0x3f] sm:$0x1] %v3256_v21  ;;  %p4198_p1 = por %p4197_p0, %p4196_p13 }
 0x88a   :  { %p4199_p2 = pnand %p4198_p1, %p4192_p12 }
 0x88c   :  { %4202 = shalt.err (!%p4199_p2)
}
 0x88d   :  { %s4203_s18 = scalar_lea.hbm %s4964_s5, 1024 }
 0x88e   :  { %p4204_p3 = scmp.ne.s32.totalorder %s4964_s5, %s4203_s18  ;;  %p4207_p4 = scmp.lt.u32.totalorder %s4203_s18, %s4964_s5 }
 0x890   :  { %p4209_p5 = pnand %p4207_p4, %p4204_p3 }
 0x892   :  { %4212 = shalt.err (!%p4209_p5)
}
 0x893   :  { %3286 = dma.vmem_to_hbm [thread:$0]  %s3281_s0, 1024, %s4964_s5, [#allocation4], %s4225_s2, %s4225_s2, %s4226_s25  }
 0x894   :  { %4217 = dma.done.wait [#allocation4], 1024  }
 0x895   :  { %4218 = vsyncadd [#allocation4], 4294966272 }
 0x896   :  { %4219 = dma.done.wait [#allocation10], 256  }
 0x897   :  { %4220 = vsyncadd [#allocation10], 4294967040 }
 0x898   :  { %3316 = vsyncpa [#allocation3], 1 }
 0x899   :  { %3317 = vsyncpa [#allocation6], 1 }
 0x89a   :  { %3318 = vsyncpa [#allocation4], 1 }
 0x89b   :  { %3319 = vsyncpa [#allocation10], 1 }

</bundles_post_ra>
